<compile_context>
chip_gen: v7x
topology: tpu7x:2x2x1
jax: 0.10.0
libtpu: 0.0.40
codegen_flags: <defaults>
</compile_context>

<pallas_src>
import jax
import jax.numpy as jnp
from jax.experimental import pallas as pl
from jax.experimental.pallas import tpu as pltpu

KH = KW = 3  # both cv1 and ODConv2d use 3x3 kernels, stride 1, pad 1

_COMPILER_PARAMS = pltpu.CompilerParams(
    dimension_semantics=("parallel", "parallel"),
    vmem_limit_bytes=32 * 1024 * 1024,
)


def _pick_row_tile(h, max_rows=8):
    # Largest divisor of H that is <= max_rows.  (At realistic sizes this would
    # be sized against the per-generation VMEM budget - halve for v7x's 64 MiB.)
    for th in range(min(h, max_rows), 0, -1):
        if h % th == 0:
            return th
    return h


# ----------------------------------------------------------------------------
# Kernel 1: cv1 = conv3x3 (no bias) + folded BN + SiLU, fused with pool partials
# ----------------------------------------------------------------------------
def make_cv1_kernel(th, w):
    def kernel(xp_ref, w_ref, scale_ref, shift_ref, y_ref, psum_ref):
        # xp_ref   : (H+2, W+2, Cin)   full padded image (re-used across row tiles)
        # w_ref    : (9*Cin, Cout)     HWIO weight flattened tap-major
        # scale/shift : (1, Cout)      folded BatchNorm
        # y_ref    : (TH, W, Cout)     row tile of SiLU(BN(conv(x)))
        # psum_ref : (8, Cout)         per-tile channel sums (replicated on 8 rows)
        cin = xp_ref.shape[-1]
        cout = y_ref.shape[-1]
        t = pl.program_id(1)
        r0 = pl.multiple_of(t * th, th)

        # im2col: 9 shifted views concatenated on the lane axis -> one K=9*Cin matmul
        cols = []
        for dy in range(KH):
            rows = xp_ref[pl.ds(r0 + dy, th), :, :]          # (TH, W+2, Cin), hoisted per dy
            for dx in range(KW):
                cols.append(rows[:, dx:dx + w, :].reshape(th * w, cin))
        xs = jnp.concatenate(cols, axis=-1)                   # (TH*W, 9*Cin)

        acc = jnp.dot(xs, w_ref[...], preferred_element_type=jnp.float32)
        yv = acc * scale_ref[0][None, :] + shift_ref[0][None, :]
        yv = yv * jax.nn.sigmoid(yv)                          # SiLU

        y_ref[...] = yv.reshape(th, w, cout).astype(y_ref.dtype)
        s = jnp.sum(yv, axis=0, keepdims=True)                # (1, Cout) tile channel sum
        psum_ref[...] = jnp.broadcast_to(s, (8, cout)).astype(psum_ref.dtype)

    return kernel


def conv1_bn_silu(x, w, scale, shift, th):
    # x: (B, H, W, Cin) NHWC.  Returns y (B, H, W, Cout) and pooled means (B, Cout).
    b, h, wd, cin = x.shape
    cout = w.shape[-1]
    nt = h // th
    xp = jnp.pad(x, ((0, 0), (1, 1), (1, 1), (0, 0)))
    hp, wp = h + 2, wd + 2

    y, psum = pl.pallas_call(
        make_cv1_kernel(th, wd),
        out_shape=(jax.ShapeDtypeStruct((b, h, wd, cout), x.dtype),
                   jax.ShapeDtypeStruct((b, nt * 8, cout), jnp.float32)),
        grid=(b, nt),
        in_specs=[
            pl.BlockSpec((None, hp, wp, cin), lambda i, t: (i, 0, 0, 0)),
            pl.BlockSpec((KH * KW * cin, cout), lambda i, t: (0, 0)),
            pl.BlockSpec((1, cout), lambda i, t: (0, 0)),
            pl.BlockSpec((1, cout), lambda i, t: (0, 0)),
        ],
        out_specs=(
            pl.BlockSpec((None, th, wd, cout), lambda i, t: (i, t, 0, 0)),
            pl.BlockSpec((None, 8, cout), lambda i, t: (i, t, 0)),
        ),
        compiler_params=_COMPILER_PARAMS,
    )(xp, w, scale, shift)

    pooled = psum.reshape(b, nt, 8, cout)[:, :, 0, :].sum(axis=1) / float(h * wd)
    return y, pooled


# ----------------------------------------------------------------------------
# Kernel 2: ODConv 3x3 with per-batch aggregated weight (+ fused residual add)
# ----------------------------------------------------------------------------
def make_odconv_kernel(th, w, add_residual):
    def kernel(yp_ref, w_ref, *rest):
        # yp_ref : (H+2, W+2, Cin)   full padded cv1 output (re-used across row tiles)
        # w_ref  : (9*Cin, Cout)     per-batch effective weight (attentions folded in)
        # res_ref: (TH, W, Cout)     residual tile of the original x  (only if add)
        # o_ref  : (TH, W, Cout)
        if add_residual:
            res_ref, o_ref = rest
        else:
            (o_ref,) = rest
        cin = yp_ref.shape[-1]
        cout = o_ref.shape[-1]
        t = pl.program_id(1)
        r0 = pl.multiple_of(t * th, th)

        cols = []
        for dy in range(KH):
            rows = yp_ref[pl.ds(r0 + dy, th), :, :]
            for dx in range(KW):
                cols.append(rows[:, dx:dx + w, :].reshape(th * w, cin))
        xs = jnp.concatenate(cols, axis=-1)                   # (TH*W, 9*Cin)

        acc = jnp.dot(xs, w_ref[...], preferred_element_type=jnp.float32)
        out = acc.reshape(th, w, cout)
        if add_residual:
            out = out + res_ref[...].astype(jnp.float32)
        o_ref[...] = out.astype(o_ref.dtype)

    return kernel


def odconv_apply(y, w_eff, res, th):
    # y: (B, H, W, Cin);  w_eff: (B, 9*Cin, Cout);  res: (B, H, W, Cout) or None.
    b, h, wd, cin = y.shape
    cout = w_eff.shape[-1]
    nt = h // th
    yp = jnp.pad(y, ((0, 0), (1, 1), (1, 1), (0, 0)))
    add = res is not None

    in_specs = [
        pl.BlockSpec((None, h + 2, wd + 2, cin), lambda i, t: (i, 0, 0, 0)),
        pl.BlockSpec((None, KH * KW * cin, cout), lambda i, t: (i, 0, 0)),
    ]
    args = [yp, w_eff]
    if add:
        in_specs.append(pl.BlockSpec((None, th, wd, cout), lambda i, t: (i, t, 0, 0)))
        args.append(res)

    return pl.pallas_call(
        make_odconv_kernel(th, wd, add),
        out_shape=jax.ShapeDtypeStruct((b, h, wd, cout), y.dtype),
        grid=(b, nt),
        in_specs=in_specs,
        out_specs=pl.BlockSpec((None, th, wd, cout), lambda i, t: (i, t, 0, 0)),
        compiler_params=_COMPILER_PARAMS,
    )(*args)


# ----------------------------------------------------------------------------
# ODConv attention head + per-batch weight aggregation (tiny: done in plain JAX)
# ----------------------------------------------------------------------------
def _odconv_dynamic_weights(pooled, p):
    # pooled: (B, Cin) global average of the cv1 output.
    # Matches Attention.forward: avgpool -> fc (no bias) -> relu (self.bn unused),
    # then the four heads; temperature = 1.0.
    a = jnp.maximum(pooled @ p['fc_w'], 0.0)                         # (B, attn_ch)
    ca = jax.nn.sigmoid(a @ p['ch_w'] + p['ch_b'])                   # (B, Cin)   channel att
    fa = jax.nn.sigmoid(a @ p['fl_w'] + p['fl_b'])                   # (B, Cout)  filter att
    sa = jax.nn.sigmoid(a @ p['sp_w'] + p['sp_b'])                   # (B, 9)     spatial att
    ka = jax.nn.softmax(a @ p['kn_w'] + p['kn_b'], axis=-1)          # (B, K)     kernel att

    w4 = p['od_weight']                                              # (K, 9, Cin, Cout)
    agg = jnp.einsum('bk,bt,ktio->btio', ka, sa, w4)                 # sum over kernel_num
    # Fold channel attention (scales conv input) and filter attention (scales the
    # bias-free conv output) directly into the per-batch weight.
    agg = agg * ca[:, None, :, None] * fa[:, None, None, :]
    b = agg.shape[0]
    return agg.reshape(b, KH * KW * agg.shape[2], agg.shape[3])      # (B, 9*Cin, Cout)


# ----------------------------------------------------------------------------
# Bottleneck_ODConv forward
# ----------------------------------------------------------------------------
def bottleneck_odconv_forward(x_nchw, params, shortcut=True):
    b, c1, h, w = x_nchw.shape
    c2 = params['od_weight'].shape[-1]
    add = shortcut and (c1 == c2)
    th = _pick_row_tile(h)

    x = jnp.transpose(x_nchw, (0, 2, 3, 1))                          # NHWC
    # cv1: conv3x3 + BN + SiLU, fused with the avg-pool partial sums.
    y, pooled = conv1_bn_silu(x, params['cv1_w'], params['bn_scale'],
                              params['bn_shift'], th)
    # cv2: ODConv2d with per-batch aggregated weight, fused residual add.
    w_eff = _odconv_dynamic_weights(pooled, params)
    out = odconv_apply(y, w_eff, x if add else None, th)
    return jnp.transpose(out, (0, 3, 1, 2))                          # back to NCHW


# ----------------------------------------------------------------------------
# deterministic synthetic parameters (shapes from the module's __init__)
# ----------------------------------------------------------------------------
def init_params(key, c1, c2, e=0.5, reduction=0.0625, kernel_num=4, min_channel=16):
    c_ = int(c2 * e)
    attn_ch = max(int(c_ * reduction), min_channel)
    ks = jax.random.split(key, 16)
    eps = 1e-5  # BatchNorm2d default

    # cv1: Conv2d(c1, c_, 3, bias=False) in HWIO, flattened to (9*c1, c_).
    cv1_w = (0.1 * jax.random.normal(ks[0], (KH, KW, c1, c_), jnp.float32)
             ).reshape(KH * KW * c1, c_)
    gamma = 1.0 + 0.1 * jax.random.normal(ks[1], (c_,), jnp.float32)
    beta = 0.1 * jax.random.normal(ks[2], (c_,), jnp.float32)
    mean = 0.1 * jax.random.normal(ks[3], (c_,), jnp.float32)
    var = 0.5 + 0.5 * jnp.abs(jax.random.normal(ks[4], (c_,), jnp.float32))
    inv = gamma / jnp.sqrt(var + eps)
    bn_scale = inv.reshape(1, c_)
    bn_shift = (beta - mean * inv).reshape(1, c_)

    # Attention head (1x1 convs become small matmuls on the pooled vector).
    fc_w = 0.2 * jax.random.normal(ks[5], (c_, attn_ch), jnp.float32)          # no bias
    ch_w = 0.2 * jax.random.normal(ks[6], (attn_ch, c_), jnp.float32)
    ch_b = 0.05 * jax.random.normal(ks[7], (c_,), jnp.float32)
    fl_w = 0.2 * jax.random.normal(ks[8], (attn_ch, c2), jnp.float32)
    fl_b = 0.05 * jax.random.normal(ks[9], (c2,), jnp.float32)
    sp_w = 0.2 * jax.random.normal(ks[10], (attn_ch, KH * KW), jnp.float32)
    sp_b = 0.05 * jax.random.normal(ks[11], (KH * KW,), jnp.float32)
    kn_w = 0.2 * jax.random.normal(ks[12], (attn_ch, kernel_num), jnp.float32)
    kn_b = 0.05 * jax.random.normal(ks[13], (kernel_num,), jnp.float32)

    # ODConv2d.weight (kernel_num, c2, c_, 3, 3) stored as (kernel_num, 9, c_, c2).
    od_weight = 0.1 * jax.random.normal(ks[14], (kernel_num, KH * KW, c_, c2),
                                        jnp.float32)

    return dict(cv1_w=cv1_w, bn_scale=bn_scale, bn_shift=bn_shift,
                fc_w=fc_w, ch_w=ch_w, ch_b=ch_b, fl_w=fl_w, fl_b=fl_b,
                sp_w=sp_w, sp_b=sp_b, kn_w=kn_w, kn_b=kn_b,
                od_weight=od_weight)


if __name__ == "__main__":
    key = jax.random.PRNGKey(0)
    kx, kp = jax.random.split(key)
    B, C, H, W = 2, 4, 16, 16                      # NCHW input, like PyTorch
    x = jax.random.normal(kx, (B, C, H, W), jnp.float32)
    params = init_params(kp, C, C)                 # c1 == c2 -> shortcut add active

    fwd = jax.jit(bottleneck_odconv_forward)
    out = fwd(x, params)
    out = jax.block_until_ready(out)

    assert out.shape == (B, C, H, W), out.shape
    assert bool(jnp.all(jnp.isfinite(out)))
    print("KERNEL_OK")
</pallas_src>

<mosaic_0001>
module attributes {stable_mosaic.version = 11 : i64} {
  func.func @kernel(%arg0: i32, %arg1: i32, %arg2: memref<1x18x18x4xf32, #tpu.memory_space<vmem>>, %arg3: memref<36x2xf32, #tpu.memory_space<vmem>>, %arg4: memref<1x2xf32, #tpu.memory_space<vmem>>, %arg5: memref<1x2xf32, #tpu.memory_space<vmem>>, %arg6: memref<1x8x16x2xf32, #tpu.memory_space<vmem>>, %arg7: memref<1x8x2xf32, #tpu.memory_space<vmem>>) attributes {dimension_semantics = [#tpu.dimension_semantics<parallel>, #tpu.dimension_semantics<parallel>], iteration_bounds = array<i64: 2, 2>, scalar_prefetch = 0 : i64, scratch_operands = 0 : i64, tpu.core_type = #tpu.core_type<tc>, window_params = [{transform_indices = @transform_0, window_bounds = array<i64: 1, 18, 18, 4>}, {pipeline_mode = #tpu.pipeline_mode<synchronous>, transform_indices = @transform_1, window_bounds = array<i64: 36, 2>}, {pipeline_mode = #tpu.pipeline_mode<synchronous>, transform_indices = @transform_2, window_bounds = array<i64: 1, 2>}, {pipeline_mode = #tpu.pipeline_mode<synchronous>, transform_indices = @transform_3, window_bounds = array<i64: 1, 2>}, {transform_indices = @transform_4, window_bounds = array<i64: 1, 8, 16, 2>}, {transform_indices = @transform_5, window_bounds = array<i64: 1, 8, 2>}]} {
    %c8_i32 = arith.constant 8 : i32
    %0 = arith.muli %arg1, %c8_i32 : i32
    %1 = tpu.assume_multiple %0, 8 : i32
    %c0_i32 = arith.constant 0 : i32
    %2 = arith.addi %1, %c0_i32 : i32
    %c0 = arith.constant 0 : index
    %3 = arith.index_cast %2 : i32 to index
    %c0_0 = arith.constant 0 : index
    %c0_1 = arith.constant 0 : index
    %4 = vector.load %arg2[%c0, %3, %c0_0, %c0_1] : memref<1x18x18x4xf32, #tpu.memory_space<vmem>>, vector<1x8x18x4xf32>
    %5 = vector.shape_cast %4 : vector<1x8x18x4xf32> to vector<8x18x4xf32>
    %6 = vector.extract_strided_slice %5 {offsets = [0, 0, 0], sizes = [8, 16, 4], strides = [1, 1, 1]} : vector<8x18x4xf32> to vector<8x16x4xf32>
    %7 = vector.shape_cast %6 : vector<8x16x4xf32> to vector<128x4xf32>
    %8 = vector.extract_strided_slice %5 {offsets = [0, 1, 0], sizes = [8, 16, 4], strides = [1, 1, 1]} : vector<8x18x4xf32> to vector<8x16x4xf32>
    %9 = vector.shape_cast %8 : vector<8x16x4xf32> to vector<128x4xf32>
    %10 = vector.extract_strided_slice %5 {offsets = [0, 2, 0], sizes = [8, 16, 4], strides = [1, 1, 1]} : vector<8x18x4xf32> to vector<8x16x4xf32>
    %11 = vector.shape_cast %10 : vector<8x16x4xf32> to vector<128x4xf32>
    %c1_i32 = arith.constant 1 : i32
    %12 = arith.addi %1, %c1_i32 : i32
    %c0_2 = arith.constant 0 : index
    %13 = arith.index_cast %12 : i32 to index
    %c0_3 = arith.constant 0 : index
    %c0_4 = arith.constant 0 : index
    %14 = vector.load %arg2[%c0_2, %13, %c0_3, %c0_4] : memref<1x18x18x4xf32, #tpu.memory_space<vmem>>, vector<1x8x18x4xf32>
    %15 = vector.shape_cast %14 : vector<1x8x18x4xf32> to vector<8x18x4xf32>
    %16 = vector.extract_strided_slice %15 {offsets = [0, 0, 0], sizes = [8, 16, 4], strides = [1, 1, 1]} : vector<8x18x4xf32> to vector<8x16x4xf32>
    %17 = vector.shape_cast %16 : vector<8x16x4xf32> to vector<128x4xf32>
    %18 = vector.extract_strided_slice %15 {offsets = [0, 1, 0], sizes = [8, 16, 4], strides = [1, 1, 1]} : vector<8x18x4xf32> to vector<8x16x4xf32>
    %19 = vector.shape_cast %18 : vector<8x16x4xf32> to vector<128x4xf32>
    %20 = vector.extract_strided_slice %15 {offsets = [0, 2, 0], sizes = [8, 16, 4], strides = [1, 1, 1]} : vector<8x18x4xf32> to vector<8x16x4xf32>
    %21 = vector.shape_cast %20 : vector<8x16x4xf32> to vector<128x4xf32>
    %c2_i32 = arith.constant 2 : i32
    %22 = arith.addi %1, %c2_i32 : i32
    %c0_5 = arith.constant 0 : index
    %23 = arith.index_cast %22 : i32 to index
    %c0_6 = arith.constant 0 : index
    %c0_7 = arith.constant 0 : index
    %24 = vector.load %arg2[%c0_5, %23, %c0_6, %c0_7] : memref<1x18x18x4xf32, #tpu.memory_space<vmem>>, vector<1x8x18x4xf32>
    %25 = vector.shape_cast %24 : vector<1x8x18x4xf32> to vector<8x18x4xf32>
    %26 = vector.extract_strided_slice %25 {offsets = [0, 0, 0], sizes = [8, 16, 4], strides = [1, 1, 1]} : vector<8x18x4xf32> to vector<8x16x4xf32>
    %27 = vector.shape_cast %26 : vector<8x16x4xf32> to vector<128x4xf32>
    %28 = vector.extract_strided_slice %25 {offsets = [0, 1, 0], sizes = [8, 16, 4], strides = [1, 1, 1]} : vector<8x18x4xf32> to vector<8x16x4xf32>
    %29 = vector.shape_cast %28 : vector<8x16x4xf32> to vector<128x4xf32>
    %30 = vector.extract_strided_slice %25 {offsets = [0, 2, 0], sizes = [8, 16, 4], strides = [1, 1, 1]} : vector<8x18x4xf32> to vector<8x16x4xf32>
    %31 = vector.shape_cast %30 : vector<8x16x4xf32> to vector<128x4xf32>
    %32 = tpu.concatenate %7, %9, %11, %17, %19, %21, %27, %29, %31 in 1 : vector<128x4xf32>, vector<128x4xf32>, vector<128x4xf32>, vector<128x4xf32>, vector<128x4xf32>, vector<128x4xf32>, vector<128x4xf32>, vector<128x4xf32>, vector<128x4xf32> -> vector<128x36xf32>
    %c0_8 = arith.constant 0 : index
    %c0_9 = arith.constant 0 : index
    %33 = vector.load %arg3[%c0_8, %c0_9] : memref<36x2xf32, #tpu.memory_space<vmem>>, vector<36x2xf32>
    %cst = arith.constant dense<0.000000e+00> : vector<128x2xf32>
    %34 = tpu.matmul %32, %33, %cst {dimension_numbers = #tpu.dot_dimension_numbers<[1], [0], [0], [1], [0, 0, 1, 1], [], []>} : vector<128x36xf32>, vector<36x2xf32>, vector<128x2xf32> -> vector<128x2xf32>
    %c0_10 = arith.constant 0 : index
    %c0_11 = arith.constant 0 : index
    %35 = vector.load %arg4[%c0_10, %c0_11] : memref<1x2xf32, #tpu.memory_space<vmem>>, vector<1x2xf32>
    %36 = vector.shape_cast %35 : vector<1x2xf32> to vector<2xf32>
    %37 = vector.shape_cast %36 : vector<2xf32> to vector<1x2xf32>
    %38 = vector.broadcast %37 : vector<1x2xf32> to vector<128x2xf32>
    %39 = arith.mulf %34, %38 : vector<128x2xf32>
    %c0_12 = arith.constant 0 : index
    %c0_13 = arith.constant 0 : index
    %40 = vector.load %arg5[%c0_12, %c0_13] : memref<1x2xf32, #tpu.memory_space<vmem>>, vector<1x2xf32>
    %41 = vector.shape_cast %40 : vector<1x2xf32> to vector<2xf32>
    %42 = vector.shape_cast %41 : vector<2xf32> to vector<1x2xf32>
    %43 = vector.broadcast %42 : vector<1x2xf32> to vector<128x2xf32>
    %44 = arith.addf %39, %43 : vector<128x2xf32>
    %45 = arith.negf %44 : vector<128x2xf32>
    %46 = math.exp %45 : vector<128x2xf32>
    %cst_14 = arith.constant 1.000000e+00 : f32
    %47 = vector.broadcast %cst_14 : f32 to vector<128x2xf32>
    %48 = arith.addf %47, %46 : vector<128x2xf32>
    %49 = arith.divf %47, %48 : vector<128x2xf32>
    %50 = arith.mulf %44, %49 : vector<128x2xf32>
    %51 = vector.shape_cast %50 : vector<128x2xf32> to vector<8x16x2xf32>
    %c0_15 = arith.constant 0 : index
    %c0_16 = arith.constant 0 : index
    %c0_17 = arith.constant 0 : index
    %c0_18 = arith.constant 0 : index
    %52 = vector.load %arg6[%c0_15, %c0_16, %c0_17, %c0_18] : memref<1x8x16x2xf32, #tpu.memory_space<vmem>>, vector<1x8x16x2xf32>
    %53 = vector.shape_cast %52 : vector<1x8x16x2xf32> to vector<8x16x2xf32>
    %54 = vector.shape_cast %51 : vector<8x16x2xf32> to vector<1x8x16x2xf32>
    tpu.vector_store %arg6[%c0_15, %c0_16, %c0_17, %c0_18], %54 {strides = array<i32>} : memref<1x8x16x2xf32, #tpu.memory_space<vmem>>, vector<1x8x16x2xf32>,
    %cst_19 = arith.constant dense<0.000000e+00> : vector<2xf32>
    %55 = vector.multi_reduction <add>, %50, %cst_19 [0] : vector<128x2xf32> to vector<2xf32>
    %56 = vector.shape_cast %55 : vector<2xf32> to vector<1x2xf32>
    %57 = vector.shape_cast %56 : vector<1x2xf32> to vector<1x2xf32>
    %58 = vector.broadcast %57 : vector<1x2xf32> to vector<8x2xf32>
    %c0_20 = arith.constant 0 : index
    %c0_21 = arith.constant 0 : index
    %c0_22 = arith.constant 0 : index
    %59 = vector.load %arg7[%c0_20, %c0_21, %c0_22] : memref<1x8x2xf32, #tpu.memory_space<vmem>>, vector<1x8x2xf32>
    %60 = vector.shape_cast %59 : vector<1x8x2xf32> to vector<8x2xf32>
    %61 = vector.shape_cast %58 : vector<8x2xf32> to vector<1x8x2xf32>
    tpu.vector_store %arg7[%c0_20, %c0_21, %c0_22], %61 {strides = array<i32>} : memref<1x8x2xf32, #tpu.memory_space<vmem>>, vector<1x8x2xf32>,
    return
  }
  func.func @transform_0(%arg0: i32, %arg1: i32) -> (i32, i32, i32, i32) {
    %c0_i32 = arith.constant 0 : i32
    %c0_i32_0 = arith.constant 0 : i32
    %c0_i32_1 = arith.constant 0 : i32
    %c0_i32_2 = arith.constant 0 : i32
    return %arg0, %c0_i32, %c0_i32_0, %c0_i32_1 : i32, i32, i32, i32
  }
  func.func @transform_1(%arg0: i32, %arg1: i32) -> (i32, i32) {
    %c0_i32 = arith.constant 0 : i32
    %c0_i32_0 = arith.constant 0 : i32
    %c0_i32_1 = arith.constant 0 : i32
    return %c0_i32, %c0_i32_0 : i32, i32
  }
  func.func @transform_2(%arg0: i32, %arg1: i32) -> (i32, i32) {
    %c0_i32 = arith.constant 0 : i32
    %c0_i32_0 = arith.constant 0 : i32
    %c0_i32_1 = arith.constant 0 : i32
    return %c0_i32, %c0_i32_0 : i32, i32
  }
  func.func @transform_3(%arg0: i32, %arg1: i32) -> (i32, i32) {
    %c0_i32 = arith.constant 0 : i32
    %c0_i32_0 = arith.constant 0 : i32
    %c0_i32_1 = arith.constant 0 : i32
    return %c0_i32, %c0_i32_0 : i32, i32
  }
  func.func @transform_4(%arg0: i32, %arg1: i32) -> (i32, i32, i32, i32) {
    %c0_i32 = arith.constant 0 : i32
    %c0_i32_0 = arith.constant 0 : i32
    %c0_i32_1 = arith.constant 0 : i32
    return %arg0, %arg1, %c0_i32, %c0_i32_0 : i32, i32, i32, i32
  }
  func.func @transform_5(%arg0: i32, %arg1: i32) -> (i32, i32, i32) {
    %c0_i32 = arith.constant 0 : i32
    %c0_i32_0 = arith.constant 0 : i32
    return %arg0, %arg1, %c0_i32 : i32, i32, i32
  }
}

module attributes {stable_mosaic.version = 11 : i64} {
  func.func @kernel(%arg0: i32, %arg1: i32, %arg2: memref<1x18x18x2xf32, #tpu.memory_space<vmem>>, %arg3: memref<1x18x4xf32, #tpu.memory_space<vmem>>, %arg4: memref<1x8x16x4xf32, #tpu.memory_space<vmem>>, %arg5: memref<1x8x16x4xf32, #tpu.memory_space<vmem>>) attributes {dimension_semantics = [#tpu.dimension_semantics<parallel>, #tpu.dimension_semantics<parallel>], iteration_bounds = array<i64: 2, 2>, scalar_prefetch = 0 : i64, scratch_operands = 0 : i64, tpu.core_type = #tpu.core_type<tc>, window_params = [{transform_indices = @transform_0, window_bounds = array<i64: 1, 18, 18, 2>}, {transform_indices = @transform_1, window_bounds = array<i64: 1, 18, 4>}, {transform_indices = @transform_2, window_bounds = array<i64: 1, 8, 16, 4>}, {transform_indices = @transform_3, window_bounds = array<i64: 1, 8, 16, 4>}]} {
    %c8_i32 = arith.constant 8 : i32
    %0 = arith.muli %arg1, %c8_i32 : i32
    %1 = tpu.assume_multiple %0, 8 : i32
    %c0_i32 = arith.constant 0 : i32
    %2 = arith.addi %1, %c0_i32 : i32
    %c0 = arith.constant 0 : index
    %3 = arith.index_cast %2 : i32 to index
    %c0_0 = arith.constant 0 : index
    %c0_1 = arith.constant 0 : index
    %4 = vector.load %arg2[%c0, %3, %c0_0, %c0_1] : memref<1x18x18x2xf32, #tpu.memory_space<vmem>>, vector<1x8x18x2xf32>
    %5 = vector.shape_cast %4 : vector<1x8x18x2xf32> to vector<8x18x2xf32>
    %6 = vector.extract_strided_slice %5 {offsets = [0, 0, 0], sizes = [8, 16, 2], strides = [1, 1, 1]} : vector<8x18x2xf32> to vector<8x16x2xf32>
    %7 = vector.shape_cast %6 : vector<8x16x2xf32> to vector<128x2xf32>
    %8 = vector.extract_strided_slice %5 {offsets = [0, 1, 0], sizes = [8, 16, 2], strides = [1, 1, 1]} : vector<8x18x2xf32> to vector<8x16x2xf32>
    %9 = vector.shape_cast %8 : vector<8x16x2xf32> to vector<128x2xf32>
    %10 = vector.extract_strided_slice %5 {offsets = [0, 2, 0], sizes = [8, 16, 2], strides = [1, 1, 1]} : vector<8x18x2xf32> to vector<8x16x2xf32>
    %11 = vector.shape_cast %10 : vector<8x16x2xf32> to vector<128x2xf32>
    %c1_i32 = arith.constant 1 : i32
    %12 = arith.addi %1, %c1_i32 : i32
    %c0_2 = arith.constant 0 : index
    %13 = arith.index_cast %12 : i32 to index
    %c0_3 = arith.constant 0 : index
    %c0_4 = arith.constant 0 : index
    %14 = vector.load %arg2[%c0_2, %13, %c0_3, %c0_4] : memref<1x18x18x2xf32, #tpu.memory_space<vmem>>, vector<1x8x18x2xf32>
    %15 = vector.shape_cast %14 : vector<1x8x18x2xf32> to vector<8x18x2xf32>
    %16 = vector.extract_strided_slice %15 {offsets = [0, 0, 0], sizes = [8, 16, 2], strides = [1, 1, 1]} : vector<8x18x2xf32> to vector<8x16x2xf32>
    %17 = vector.shape_cast %16 : vector<8x16x2xf32> to vector<128x2xf32>
    %18 = vector.extract_strided_slice %15 {offsets = [0, 1, 0], sizes = [8, 16, 2], strides = [1, 1, 1]} : vector<8x18x2xf32> to vector<8x16x2xf32>
    %19 = vector.shape_cast %18 : vector<8x16x2xf32> to vector<128x2xf32>
    %20 = vector.extract_strided_slice %15 {offsets = [0, 2, 0], sizes = [8, 16, 2], strides = [1, 1, 1]} : vector<8x18x2xf32> to vector<8x16x2xf32>
    %21 = vector.shape_cast %20 : vector<8x16x2xf32> to vector<128x2xf32>
    %c2_i32 = arith.constant 2 : i32
    %22 = arith.addi %1, %c2_i32 : i32
    %c0_5 = arith.constant 0 : index
    %23 = arith.index_cast %22 : i32 to index
    %c0_6 = arith.constant 0 : index
    %c0_7 = arith.constant 0 : index
    %24 = vector.load %arg2[%c0_5, %23, %c0_6, %c0_7] : memref<1x18x18x2xf32, #tpu.memory_space<vmem>>, vector<1x8x18x2xf32>
    %25 = vector.shape_cast %24 : vector<1x8x18x2xf32> to vector<8x18x2xf32>
    %26 = vector.extract_strided_slice %25 {offsets = [0, 0, 0], sizes = [8, 16, 2], strides = [1, 1, 1]} : vector<8x18x2xf32> to vector<8x16x2xf32>
    %27 = vector.shape_cast %26 : vector<8x16x2xf32> to vector<128x2xf32>
    %28 = vector.extract_strided_slice %25 {offsets = [0, 1, 0], sizes = [8, 16, 2], strides = [1, 1, 1]} : vector<8x18x2xf32> to vector<8x16x2xf32>
    %29 = vector.shape_cast %28 : vector<8x16x2xf32> to vector<128x2xf32>
    %30 = vector.extract_strided_slice %25 {offsets = [0, 2, 0], sizes = [8, 16, 2], strides = [1, 1, 1]} : vector<8x18x2xf32> to vector<8x16x2xf32>
    %31 = vector.shape_cast %30 : vector<8x16x2xf32> to vector<128x2xf32>
    %32 = tpu.concatenate %7, %9, %11, %17, %19, %21, %27, %29, %31 in 1 : vector<128x2xf32>, vector<128x2xf32>, vector<128x2xf32>, vector<128x2xf32>, vector<128x2xf32>, vector<128x2xf32>, vector<128x2xf32>, vector<128x2xf32>, vector<128x2xf32> -> vector<128x18xf32>
    %c0_8 = arith.constant 0 : index
    %c0_9 = arith.constant 0 : index
    %c0_10 = arith.constant 0 : index
    %33 = vector.load %arg3[%c0_8, %c0_9, %c0_10] : memref<1x18x4xf32, #tpu.memory_space<vmem>>, vector<1x18x4xf32>
    %34 = vector.shape_cast %33 : vector<1x18x4xf32> to vector<18x4xf32>
    %cst = arith.constant dense<0.000000e+00> : vector<128x4xf32>
    %35 = tpu.matmul %32, %34, %cst {dimension_numbers = #tpu.dot_dimension_numbers<[1], [0], [0], [1], [0, 0, 1, 1], [], []>} : vector<128x18xf32>, vector<18x4xf32>, vector<128x4xf32> -> vector<128x4xf32>
    %36 = vector.shape_cast %35 : vector<128x4xf32> to vector<8x16x4xf32>
    %c0_11 = arith.constant 0 : index
    %c0_12 = arith.constant 0 : index
    %c0_13 = arith.constant 0 : index
    %c0_14 = arith.constant 0 : index
    %37 = vector.load %arg4[%c0_11, %c0_12, %c0_13, %c0_14] : memref<1x8x16x4xf32, #tpu.memory_space<vmem>>, vector<1x8x16x4xf32>
    %38 = vector.shape_cast %37 : vector<1x8x16x4xf32> to vector<8x16x4xf32>
    %39 = arith.addf %36, %38 : vector<8x16x4xf32>
    %c0_15 = arith.constant 0 : index
    %c0_16 = arith.constant 0 : index
    %c0_17 = arith.constant 0 : index
    %c0_18 = arith.constant 0 : index
    %40 = vector.load %arg5[%c0_15, %c0_16, %c0_17, %c0_18] : memref<1x8x16x4xf32, #tpu.memory_space<vmem>>, vector<1x8x16x4xf32>
    %41 = vector.shape_cast %40 : vector<1x8x16x4xf32> to vector<8x16x4xf32>
    %42 = vector.shape_cast %39 : vector<8x16x4xf32> to vector<1x8x16x4xf32>
    tpu.vector_store %arg5[%c0_15, %c0_16, %c0_17, %c0_18], %42 {strides = array<i32>} : memref<1x8x16x4xf32, #tpu.memory_space<vmem>>, vector<1x8x16x4xf32>,
    return
  }
  func.func @transform_0(%arg0: i32, %arg1: i32) -> (i32, i32, i32, i32) {
    %c0_i32 = arith.constant 0 : i32
    %c0_i32_0 = arith.constant 0 : i32
    %c0_i32_1 = arith.constant 0 : i32
    %c0_i32_2 = arith.constant 0 : i32
    return %arg0, %c0_i32, %c0_i32_0, %c0_i32_1 : i32, i32, i32, i32
  }
  func.func @transform_1(%arg0: i32, %arg1: i32) -> (i32, i32, i32) {
    %c0_i32 = arith.constant 0 : i32
    %c0_i32_0 = arith.constant 0 : i32
    %c0_i32_1 = arith.constant 0 : i32
    return %arg0, %c0_i32, %c0_i32_0 : i32, i32, i32
  }
  func.func @transform_2(%arg0: i32, %arg1: i32) -> (i32, i32, i32, i32) {
    %c0_i32 = arith.constant 0 : i32
    %c0_i32_0 = arith.constant 0 : i32
    %c0_i32_1 = arith.constant 0 : i32
    return %arg0, %arg1, %c0_i32, %c0_i32_0 : i32, i32, i32, i32
  }
  func.func @transform_3(%arg0: i32, %arg1: i32) -> (i32, i32, i32, i32) {
    %c0_i32 = arith.constant 0 : i32
    %c0_i32_0 = arith.constant 0 : i32
    %c0_i32_1 = arith.constant 0 : i32
    return %arg0, %arg1, %c0_i32, %c0_i32_0 : i32, i32, i32, i32
  }
}

</mosaic_0001>

<bundles_post_ra>
// kernel: bottleneck_odconv_forward.2
= control target key start
LH: loop header
LB: loop body
LE: loop exit
PB: predicated region body
PF: predicated region fallthrough
CT: control target
= control target key end

     0   :  { %s2112_s18 = smov 0   ;;  %s2114_s19 = smov 0   ;;  %s2873_s0 = inlined_call_operand.vmem [shape: f32[2,18,18,4], index: 0, kind: input, shape index: {}]   ;;  %s2874_s1 = inlined_call_operand.vmem [shape: f32[36,2], index: 1, kind: input, shape index: {}]   ;;  %s2875_s2 = inlined_call_operand.vmem [shape: f32[1,2], index: 2, kind: input, shape index: {}]   ;;  %s2876_s3 = inlined_call_operand.vmem [shape: f32[1,2], index: 3, kind: input, shape index: {}]   ;;  %s2877_s4 = inlined_call_operand.vmem [shape: f32[2,16,16,2], index: 4, kind: output, shape index: {0}]   ;;  %s2878_s5 = inlined_call_operand.vmem [shape: f32[2,16,2], index: 5, kind: output, shape index: {1}]  }
   0x1   :  { %s2116_s20 = smov 0   ;;  %s2118_s21 = smov 0  }
   0x2   :  { %s2120_s22 = smov 0  }
   0x3 LB: > { %s25_s23 = sadd.s32 1, %s2064_s20  ;;  %s28_s24 = sadd.s32 1, %s2068_s21  ;;  %s2072_s22 = sphi %s2120_s22, %s16_s22   ;;  %s2068_s21 = sphi %s2118_s21, %s2882_s21   ;;  %s2064_s20 = sphi %s2116_s20, %s2881_s20   ;;  %s2060_s19 = sphi %s2114_s19, %s2880_s19   ;;  %s2056_s18 = sphi %s2112_s18, %s2879_s18  }
   0x4   : > { %p26_p0 = scmp.ge.s32.totalorder %s25_s23, 2  ;;  %p1753_p1 = scmp.ge.s32.totalorder %s2072_s22, 1 }
   0x5   : > { %p206_p2 = scmp.lt.s32.totalorder %s2072_s22, 5 }
   0x6   : > { %s2884_s23 = smov (%p26_p0, %s25_s23), 0  ;;  %s2886_s24 = smov (!%p26_p0, %s28_s24), %s2068_s21 }
   0x7   : > { %p207_p3 = pnand %p1753_p1, %p206_p2  ;;  %p30_p4 = scmp.ge.s32.totalorder %s2886_s24, 2 }
   0x8   : > { %p247_p5 = scmp.lt.s32.totalorder (!%p207_p3), %s2060_s19, 1  ;;  %s1762_s25 = smul.u32 (!%p207_p3), 192, %s2056_s18  ;;  %vm363_vm0 = vcmask (!%p207_p3), 1045504   ;;  %vm322_vm1 = vcmask (!%p207_p3), 1046528   ;;  %v1186_v32 = vld [vmem:[%s2874_s1] sm:$0xff] (!%p207_p3)  ;;  %v1187_v33 = vld [vmem:[%s2874_s1 + $0x8] sm:$0xff] (!%p207_p3) }
   0x9   : > { %s2888_s24 = smov (%p30_p4, %s2886_s24), 0  ;;  %210 = sbr.rel (%p207_p3) target bundleno = 656 (0x290), region = 36 }
   0xa   : > { %s2074_s6 = smov (!%p207_p3), 12   ;;  %s2075_s7 = smov (!%p207_p3), 8   ;;  %v1907_v34 = vpack.c.bf16 (!%p207_p3), %v1187_v33, %v1186_v32  ;;  %v1188_v38 = vld [vmem:[%s2874_s1 + $0x10] sm:$0xff] (!%p207_p3)  ;;  %v1189_v39 = vld [vmem:[%s2874_s1 + $0x18] sm:$0xff] (!%p207_p3)  ;;  %v1190_v43 = vld [vmem:[%s2874_s1 + $0x20] sm:$0xf] (!%p207_p3) }
   0xb   : > { %s2076_s8 = smov (!%p207_p3), 4   ;;  %s2077_s9 = smov (!%p207_p3), 16   ;;  %v1911_v41 = vpack.c.bf16 (!%p207_p3), %v1189_v39, %v1188_v38  ;;  %vm1240_vm2 = vcmask (!%p207_p3), 1043456   ;;  %vm1050_vm3 = vcmask (!%p207_p3), 31744   ;;  %vm1067_vm4 = vcmask (!%p207_p3), 64512  }
   0xc   : > { %s2078_s10 = smov (!%p207_p3), 20   ;;  %s2079_s15 = smov (!%p207_p3), 24   ;;  %1908 = vmatprep.subr.bf16.mxu0 (!%p207_p3), %v1907_v34  ;;  %1915 = vmatprep.subr.bf16.mxu1 (!%p207_p3), %v1907_v34  ;;  %vm1084_vm5 = vcmask (!%p207_p3), 97280   ;;  %vm1101_vm6 = vcmask (!%p207_p3), 130048   ;;  %vm1118_vm7 = vcmask (!%p207_p3), 162816   ;;  %vm1135_vm8 = vcmask (!%p207_p3), 195584  }
   0xd   : > { %1910 = vmatpush3.bf16.msra.mxu0 (!%p207_p3), %v1907_v34  ;;  %1918 = vmatpush3.bf16.msra.mxu1 (!%p207_p3), %v1907_v34  ;;  %s2080_s27 = smov (!%p207_p3), 28   ;;  %s2081_s11 = smov (!%p207_p3), 32   ;;  %vm1152_vm9 = vcmask (!%p207_p3), 228352   ;;  %vm1169_vm10 = vcmask (!%p207_p3), 261120   ;;  %vm1191_vm11 = vcmask (!%p207_p3), 293888   ;;  %vm1547_vm12 = vcmask (!%p207_p3), 15360  }
   0xe   : > { %1912 = vmatprep.subr.bf16.mxu0 (!%p207_p3), %v1911_v41  ;;  %1916 = vmatprep.subr.bf16.mxu1 (!%p207_p3), %v1911_v41  ;;  %p265_p7 = scmp.lt.s32.totalorder (!%p207_p3), %s2056_s18, 1 }
  0x10   : > { %s2890_s19 = smov (!%p247_p5, %s2060_s19), 1 }
  0x11   : > { %s1921_s26 = smul.u32 432, %s2890_s19  ;;  %1914 = vmatpush3.bf16.msra.mxu0 %v1911_v41  ;;  %1919 = vmatpush3.bf16.msra.mxu1 %v1911_v41  ;;  %s1757_s12 = sshll.u32 %s2890_s19, 5 }
  0x12   : > { %1881 = vmatprep.subr.msk.mxu0 %vm1240_vm2, %v1190_v43  ;;  %1917 = vmatprep.subr.msk.mxu1 %vm1240_vm2, %v1190_v43 }
  0x13   : > { %s251_s29 = scalar_lea.vmem %s2873_s0, %s1921_s26 }
  0x14   : > { %s2151_s30 = scalar_lea.vmem %s251_s29, %s1762_s25  ;;  %s1759_s25 = sshll.u32 %s2890_s19, 1 }
  0x15   : > { %v2154_v0 = vld [vmem:[%s2151_s30 + $0x20] sm:$0xff]  ;;  %v2157_v1 = vld [vmem:[%s2151_s30 + $0x18] sm:$0xff]  ;;  %v2167_v3 = vld [vmem:[%s2151_s30 + $0x8] sm:$0xff]  ;;  %1882 = vmatpush3.msk.msra.mxu0 %vm1240_vm2, %v1190_v43  ;;  %1920 = vmatpush3.msk.msra.mxu1 %vm1240_vm2, %v1190_v43 }
  0x16   : > { %v2160_v2 = vld [vmem:[%s2151_s30] sm:$0xff]  ;;  %764 = vrot.lane.b32.xlu1 %v2154_v0, %s2074_s6  ;;  %762 = vrot.lane.b32.xlu0 %v2157_v1, %s2074_s6  ;;  %v365_v5 = vrot.slane %v2167_v3, 2  ;;  %v324_v7 = vrot.slane %v2167_v3, 1  ;;  %v276_v8 = vld [vmem:[%s2151_s30 + $0x10] sm:$0x3]  ;;  %v456_v13 = vrot.slane %v2154_v0, 1 }
  0x17   : > { %v364_v4 = vrot.slane %v2160_v2, 2  ;;  %v323_v6 = vrot.slane %v2160_v2, 1  ;;  %v367_v9 = vrot.slane %v276_v8, 2  ;;  %v326_v10 = vrot.slane %v276_v8, 1  ;;  %v1767_v17 = vld [vmem:[%s2151_s30 + $0x28] sm:$0x3] }
  0x18   : > { %v455_v14 = vrot.slane %v2157_v1, 1  ;;  %v496_v18 = vrot.slane %v2154_v0, 2  ;;  %v495_v19 = vrot.slane %v2157_v1, 2  ;;  %v458_v21 = vrot.slane %v1767_v17, 1  ;;  %v279_v22 = vld [vmem:[%s2151_s30 + $0x28] sm:$0x3] }
  0x19   : > { %v366_v11 = vsel %vm363_vm0, %v364_v4, %v365_v5  ;;  %v325_v12 = vsel %vm322_vm1, %v323_v6, %v324_v7  ;;  %v368_v15 = vsel %vm363_vm0, %v365_v5, %v367_v9  ;;  %v327_v16 = vsel %vm322_vm1, %v324_v7, %v326_v10  ;;  %v2199_v28 = vld [vmem:[%s2151_s30 + $0x30] sm:$0xff]  ;;  %v2203_v31 = vld [vmem:[%s2151_s30 + $0x38] sm:$0xff]  ;;  %v1793_v42 = vld [vmem:[%s2151_s30 + $0x40] sm:$0x3] }
  0x1a   : > { %714 = vrot.lane.b32.xlu1 %v366_v11, %s2075_s7  ;;  %666 = vrot.lane.b32.xlu0 %v325_v12, %s2076_s8  ;;  %v330_v20 = vsel %vm322_vm1, %v455_v14, %v456_v13  ;;  %v497_v23 = vsel %vm363_vm0, %v495_v19, %v496_v18  ;;  %v459_v24 = vsel %vm322_vm1, %v456_v13, %v458_v21  ;;  %v331_v25 = vrot.slane %v279_v22, 1  ;;  %v1770_v47 = vld [vmem:[%s2151_s30 + $0x40] sm:$0x3]  ;;  %v2255_v58 = vld [vmem:[%s2151_s30 + $0x48] sm:$0xff] }
  0x1b   : > { %v498_v27 = vrot.slane %v1767_v17, 2  ;;  %v372_v30 = vrot.slane %v279_v22, 2  ;;  %v586_v35 = vrot.slane %v2199_v28, 1  ;;  %v587_v37 = vrot.slane %v2203_v31, 1  ;;  %v282_v53 = vld [vmem:[%s2151_s30 + $0x40] sm:$0x3] }
  0x1c   : > { %v332_v26 = vsel %vm322_vm1, %v456_v13, %v331_v25  ;;  %v626_v44 = vrot.slane %v2199_v28, 2  ;;  %v627_v45 = vrot.slane %v2203_v31, 2  ;;  %v589_v46 = vrot.slane %v1793_v42, 1  ;;  %v2259_v61 = vld [vmem:[%s2151_s30 + $0x50] sm:$0xff]  ;;  %v1796_v6 = vld [vmem:[%s2151_s30 + $0x58] sm:$0x3] }
  0x1d   : > { %v499_v29 = vsel %vm363_vm0, %v496_v18, %v498_v27  ;;  %v373_v36 = vsel %vm363_vm0, %v496_v18, %v372_v30  ;;  %v588_v40 = vsel %vm322_vm1, %v586_v35, %v587_v37  ;;  %v463_v50 = vrot.slane %v1770_v47, 1  ;;  %v1773_v10 = vld [vmem:[%s2151_s30 + $0x58] sm:$0x3]  ;;  %v2296_v21 = vld [vmem:[%s2151_s30 + $0x60] sm:$0xff]  ;;  %v1799_v30 = vld [vmem:[%s2151_s30 + $0x70] sm:$0x3] }
  0x1e   : > { %716 = vrot.lane.b32.xlu1 %v368_v15, %s2075_s7  ;;  %668 = vrot.lane.b32.xlu0 %v327_v16, %s2076_s8  ;;  %v628_v48 = vsel %vm363_vm0, %v626_v44, %v627_v45  ;;  %v590_v49 = vsel %vm322_vm1, %v587_v37, %v589_v46  ;;  %v629_v52 = vrot.slane %v1793_v42, 2  ;;  %v336_v55 = vrot.slane %v282_v53, 1  ;;  %v285_v16 = vld [vmem:[%s2151_s30 + $0x58] sm:$0x3]  ;;  %v1776_v35 = vld [vmem:[%s2151_s30 + $0x70] sm:$0x3] }
  0x1f   : > { %v464_v51 = vsel %vm322_vm1, %v587_v37, %v463_v50  ;;  %v503_v57 = vrot.slane %v1770_v47, 2  ;;  %v377_v60 = vrot.slane %v282_v53, 2  ;;  %v591_v62 = vrot.slane %v2255_v58, 1  ;;  %v288_v41 = vld [vmem:[%s2151_s30 + $0x70] sm:$0x3]  ;;  %v2345_v53 = vld [vmem:[%s2151_s30 + $0x80] sm:$0xff] }
  0x20   : > { %v630_v54 = vsel %vm363_vm0, %v627_v45, %v629_v52  ;;  %v337_v56 = vsel %vm322_vm1, %v587_v37, %v336_v55  ;;  %v592_v4 = vrot.slane %v2259_v61, 1  ;;  %v631_v7 = vrot.slane %v2255_v58, 2 }
  0x21   : > { %v504_v59 = vsel %vm363_vm0, %v627_v45, %v503_v57  ;;  %v378_v63 = vsel %vm363_vm0, %v627_v45, %v377_v60  ;;  %v632_v8 = vrot.slane %v2259_v61, 2  ;;  %v594_v9 = vrot.slane %v1796_v6, 1 }
  0x22   : > { %670 = vrot.lane.b32.xlu1 %v330_v20, %s2076_s8  ;;  %810 = vrot.lane.b32.xlu0 %v330_v20, %s2077_s9  ;;  %v593_v5 = vsel %vm322_vm1, %v591_v62, %v592_v4  ;;  %v468_v13 = vrot.slane %v1773_v10, 1  ;;  %v634_v15 = vrot.slane %v1796_v6, 2  ;;  %v341_v18 = vrot.slane %v285_v16, 1 }
  0x23   : > { %v633_v11 = vsel %vm363_vm0, %v631_v7, %v632_v8  ;;  %v595_v12 = vsel %vm322_vm1, %v592_v4, %v594_v9  ;;  %v508_v20 = vrot.slane %v1773_v10, 2  ;;  %v596_v25 = vrot.slane %v2296_v21, 1  ;;  %v1779_v10 = vld [vmem:[%s2151_s30 + $0x88] sm:$0x3] }
  0x24   : > { %v469_v14 = vsel %vm322_vm1, %v592_v4, %v468_v13  ;;  %v635_v17 = vsel %vm363_vm0, %v632_v8, %v634_v15  ;;  %v342_v19 = vsel %vm322_vm1, %v592_v4, %v341_v18  ;;  %v636_v32 = vrot.slane %v2296_v21, 2  ;;  %v1802_v4 = vld [vmem:[%s2151_s30 + $0x88] sm:$0x3] }
  0x25   : > { %v509_v22 = vsel %vm363_vm0, %v632_v8, %v508_v20  ;;  %v599_v34 = vrot.slane %v1799_v30, 1  ;;  %v473_v38 = vrot.slane %v1776_v35, 1  ;;  %v346_v43 = vrot.slane %v288_v41, 1  ;;  %v291_v20 = vld [vmem:[%s2151_s30 + $0x88] sm:$0x3] }
  0x26   : > { %858 = vrot.lane.b32.xlu1 %v497_v23, %s2078_s10  ;;  %812 = vrot.lane.b32.xlu0 %v459_v24, %s2077_s9  ;;  %v2300_v24 = vld [vmem:[%s2151_s30 + $0x68] sm:$0xff]  ;;  %v513_v45 = vrot.slane %v1776_v35, 2  ;;  %v387_v50 = vrot.slane %v288_v41, 2  ;;  %v642_v6 = vrot.slane %v2345_v53, 2  ;;  %v604_v7 = vrot.slane %v1802_v4, 1 }
  0x27   : > { %v597_v27 = vrot.slane %v2300_v24, 1  ;;  %v637_v33 = vrot.slane %v2300_v24, 2  ;;  %v478_v13 = vrot.slane %v1779_v10, 1 }
  0x29   : > { %v600_v37 = vsel %vm322_vm1, %v597_v27, %v599_v34  ;;  %v474_v39 = vsel %vm322_vm1, %v597_v27, %v473_v38  ;;  %v347_v44 = vsel %vm322_vm1, %v597_v27, %v346_v43  ;;  %v388_v55 = vsel %vm363_vm0, %v637_v33, %v387_v50 }
  0x2a   : > { %718 = vrot.lane.b32.xlu1 %v497_v23, %s2075_s7  ;;  %672 = vrot.lane.b32.xlu0 %v332_v26, %s2076_s8  ;;  %v382_v23 = vrot.slane %v285_v16, 2 }
  0x2c   : > { %v383_v26 = vsel %vm363_vm0, %v632_v8, %v382_v23  ;;  %v351_v23 = vrot.slane %v291_v20, 1 }
  0x2e   : > { %906 = vrot.lane.b32.xlu1 %v2199_v28, %s2079_s15  ;;  %860 = vrot.lane.b32.xlu0 %v499_v29, %s2078_s10  ;;  %v598_v29 = vsel %vm322_vm1, %v596_v25, %v597_v27 }
  0x32   : > { %766 = vrot.lane.b32.xlu1 %v2199_v28, %s2074_s6  ;;  %720 = vrot.lane.b32.xlu0 %v373_v36, %s2075_s7  ;;  %v638_v36 = vsel %vm363_vm0, %v636_v32, %v637_v33 }
  0x36   : > { %954 = vrot.lane.b32.xlu1 %v588_v40, %s2080_s27  ;;  %908 = vrot.lane.b32.xlu0 %v2203_v31, %s2079_s15 }
  0x3a   : > { %814 = vrot.lane.b32.xlu1 %v588_v40, %s2077_s9  ;;  %768 = vrot.lane.b32.xlu0 %v2203_v31, %s2074_s6 }
  0x3e   : > { %1002 = vrot.lane.b32.xlu1 %v628_v48, %s2081_s11  ;;  %956 = vrot.lane.b32.xlu0 %v590_v49, %s2080_s27  ;;  %v514_v49 = vsel %vm363_vm0, %v637_v33, %v513_v45 }
  0x42   : > { %816 = vrot.lane.b32.xlu1 %v464_v51, %s2077_s9  ;;  %674 = vrot.lane.b32.xlu0 %v588_v40, %s2076_s8  ;;  %v639_v40 = vrot.slane %v1799_v30, 2  ;;  %v518_v30 = vrot.slane %v1779_v10, 2 }
  0x44   : > { %v640_v42 = vsel %vm363_vm0, %v637_v33, %v639_v40  ;;  %v519_v35 = vsel %vm363_vm0, %v642_v6, %v518_v30  ;;  %v2409_v40 = vld [vmem:[%s2151_s30 + $0x98] sm:$0xff] }
  0x46   : > { %1004 = vrot.lane.b32.xlu1 %v630_v54, %s2081_s11  ;;  %862 = vrot.lane.b32.xlu0 %v628_v48, %s2078_s10 }
  0x4a   : > { %722 = vrot.lane.b32.xlu1 %v628_v48, %s2075_s7  ;;  %676 = vrot.lane.b32.xlu0 %v337_v56, %s2076_s8  ;;  %v2341_v48 = vld [vmem:[%s2151_s30 + $0x78] sm:$0xff]  ;;  %v602_v56 = vrot.slane %v2345_v53, 1 }
  0x4b   : > { %v601_v54 = vrot.slane %v2341_v48, 1 }
  0x4c   : > { %v479_v16 = vsel %vm322_vm1, %v602_v56, %v478_v13 }
  0x4d   : > { %v603_v60 = vsel %vm322_vm1, %v601_v54, %v602_v56 }
  0x4e   : > { %910 = vrot.lane.b32.xlu1 %v2255_v58, %s2079_s15  ;;  %864 = vrot.lane.b32.xlu0 %v504_v59, %s2078_s10 }
  0x52   : > { %770 = vrot.lane.b32.xlu1 %v2255_v58, %s2074_s6  ;;  %724 = vrot.lane.b32.xlu0 %v378_v63, %s2075_s7 }
  0x56   : > { %958 = vrot.lane.b32.xlu1 %v593_v5, %s2080_s27  ;;  %912 = vrot.lane.b32.xlu0 %v2259_v61, %s2079_s15 }
  0x5a   : > { %818 = vrot.lane.b32.xlu1 %v593_v5, %s2077_s9  ;;  %772 = vrot.lane.b32.xlu0 %v2259_v61, %s2074_s6 }
  0x5e   : > { %1006 = vrot.lane.b32.xlu1 %v633_v11, %s2081_s11  ;;  %960 = vrot.lane.b32.xlu0 %v595_v12, %s2080_s27  ;;  %v605_v12 = vsel %vm322_vm1, %v602_v56, %v604_v7 }
  0x62   : > { %820 = vrot.lane.b32.xlu1 %v469_v14, %s2077_s9  ;;  %678 = vrot.lane.b32.xlu0 %v593_v5, %s2076_s8  ;;  %v641_v5 = vrot.slane %v2341_v48, 2 }
  0x66   : > { %1008 = vrot.lane.b32.xlu1 %v635_v17, %s2081_s11  ;;  %866 = vrot.lane.b32.xlu0 %v633_v11, %s2078_s10  ;;  %v644_v17 = vrot.slane %v1802_v4, 2 }
  0x6a   : > { %726 = vrot.lane.b32.xlu1 %v633_v11, %s2075_s7  ;;  %680 = vrot.lane.b32.xlu0 %v342_v19, %s2076_s8  ;;  %v643_v11 = vsel %vm363_vm0, %v641_v5, %v642_v6 }
  0x6e   : > { %914 = vrot.lane.b32.xlu1 %v2296_v21, %s2079_s15  ;;  %868 = vrot.lane.b32.xlu0 %v509_v22, %s2078_s10  ;;  %v645_v22 = vsel %vm363_vm0, %v642_v6, %v644_v17 }
  0x72   : > { %774 = vrot.lane.b32.xlu1 %v2296_v21, %s2074_s6  ;;  %728 = vrot.lane.b32.xlu0 %v383_v26, %s2075_s7 }
  0x76   : > { %962 = vrot.lane.b32.xlu1 %v598_v29, %s2080_s27  ;;  %916 = vrot.lane.b32.xlu0 %v2300_v24, %s2079_s15 }
  0x7a   : > { %822 = vrot.lane.b32.xlu1 %v598_v29, %s2077_s9  ;;  %776 = vrot.lane.b32.xlu0 %v2300_v24, %s2074_s6 }
  0x7e   : > { %1010 = vrot.lane.b32.xlu1 %v638_v36, %s2081_s11  ;;  %964 = vrot.lane.b32.xlu0 %v600_v37, %s2080_s27 }
  0x82   : > { %824 = vrot.lane.b32.xlu1 %v474_v39, %s2077_s9  ;;  %682 = vrot.lane.b32.xlu0 %v598_v29, %s2076_s8  ;;  %v352_v29 = vsel %vm322_vm1, %v602_v56, %v351_v23 }
  0x86   : > { %1012 = vrot.lane.b32.xlu1 %v640_v42, %s2081_s11  ;;  %870 = vrot.lane.b32.xlu0 %v638_v36, %s2078_s10 }
  0x88   : > { %v2334_v46 = vpop.permute.xlu1 %764  ;;  %v2336_v47 = vpop.permute.xlu0 %762 }
  0x8a   : > { %730 = vrot.lane.b32.xlu1 %v638_v36, %s2075_s7  ;;  %684 = vrot.lane.b32.xlu0 %v347_v44, %s2076_s8  ;;  %v392_v36 = vrot.slane %v291_v20, 2 }
  0x8c   : > { %v715_v51 = vpop.permute.xlu1 %714  ;;  %v667_v52 = vpop.permute.xlu0 %666 }
  0x8d   : > { %v1051_v27 = vsel %vm1050_vm3, %v2160_v2, %v667_v52  ;;  %v2399_v2 = vld [vmem:[%s2151_s30 + $0x90] sm:$0xff] }
  0x8e   : > { %918 = vrot.lane.b32.xlu1 %v2341_v48, %s2079_s15  ;;  %872 = vrot.lane.b32.xlu0 %v514_v49, %s2078_s10  ;;  %v1068_v34 = vsel %vm1067_vm4, %v1051_v27, %v715_v51  ;;  %v606_v45 = vrot.slane %v2399_v2, 1  ;;  %v607_v49 = vrot.slane %v2409_v40, 1 }
  0x8f   : > { %v1085_v37 = vsel %vm1084_vm5, %v1068_v34, %v2336_v47  ;;  %v393_v47 = vsel %vm363_vm0, %v642_v6, %v392_v36  ;;  %v646_v6 = vrot.slane %v2399_v2, 2 }
  0x90   : > { %v2353_v57 = vpop.permute.xlu1 %716  ;;  %v669_v59 = vpop.permute.xlu0 %668 }
  0x91   : > { %v1052_v42 = vsel %vm1050_vm3, %v2167_v3, %v669_v59 }
  0x92   : > { %778 = vrot.lane.b32.xlu1 %v2341_v48, %s2074_s6  ;;  %732 = vrot.lane.b32.xlu0 %v388_v55, %s2075_s7  ;;  %v1069_v52 = vsel %vm1067_vm4, %v1052_v42, %v2353_v57  ;;  %v608_v55 = vsel %vm322_vm1, %v606_v45, %v607_v49  ;;  %v1805_v57 = vld [vmem:[%s2151_s30 + $0xa0] sm:$0x3] }
  0x93   : > { %v1086_v56 = vsel %vm1084_vm5, %v1069_v52, %v2334_v46  ;;  %v647_v46 = vrot.slane %v2409_v40, 2  ;;  %v609_v7 = vrot.slane %v1805_v57, 1 }
  0x94   : > { %v2359_v62 = vpop.permute.xlu1 %670  ;;  %v811_v63 = vpop.permute.xlu0 %810 }
  0x95   : > { %v1102_v41 = vsel %vm1101_vm6, %v1085_v37, %v811_v63  ;;  %v648_v13 = vsel %vm363_vm0, %v646_v6, %v647_v46  ;;  %v1053_v42 = vsel %vm1050_vm3, %v2157_v1, %v2359_v62  ;;  %v2492_v1 = vld [vmem:[%s2151_s30 + $0xb0] sm:$0xff] }
  0x96   : > { %966 = vrot.lane.b32.xlu1 %v603_v60, %s2080_s27  ;;  %920 = vrot.lane.b32.xlu0 %v2345_v53, %s2079_s15 }
  0x98   : > { %v859_v8 = vpop.permute.xlu1 %858  ;;  %v2367_v9 = vpop.permute.xlu0 %812 }
  0x99   : > { %v1119_v43 = vsel %vm1118_vm7, %v1102_v41, %v859_v8  ;;  %v1103_v63 = vsel %vm1101_vm6, %v1086_v56, %v2367_v9 }
  0x9a   : > { %826 = vrot.lane.b32.xlu1 %v603_v60, %s2077_s9  ;;  %780 = vrot.lane.b32.xlu0 %v2345_v53, %s2074_s6 }
  0x9c   : > { %v2375_v14 = vpop.permute.xlu1 %718  ;;  %v2377_v15 = vpop.permute.xlu0 %672 }
  0x9e   : > { %1014 = vrot.lane.b32.xlu1 %v643_v11, %s2081_s11  ;;  %968 = vrot.lane.b32.xlu0 %v605_v12, %s2080_s27  ;;  %v1782_v12 = vld [vmem:[%s2151_s30 + $0xa0] sm:$0x3] }
  0x9f   : > { %v483_v17 = vrot.slane %v1782_v12, 1  ;;  %v523_v36 = vrot.slane %v1782_v12, 2 }
  0xa0   : > { %v907_v18 = vpop.permute.xlu1 %906  ;;  %v861_v19 = vpop.permute.xlu0 %860 }
  0xa1   : > { %v1136_v44 = vsel %vm1135_vm8, %v1119_v43, %v907_v18  ;;  %v1120_v4 = vsel %vm1118_vm7, %v1103_v63, %v861_v19  ;;  %v484_v20 = vsel %vm322_vm1, %v607_v49, %v483_v17  ;;  %v1070_v43 = vsel %vm1067_vm4, %v1053_v42, %v2375_v14 }
  0xa2   : > { %828 = vrot.lane.b32.xlu1 %v479_v16, %s2077_s9  ;;  %686 = vrot.lane.b32.xlu0 %v603_v60, %s2076_s8  ;;  %v610_v16 = vsel %vm322_vm1, %v607_v49, %v609_v7  ;;  %v524_v45 = vsel %vm363_vm0, %v647_v46, %v523_v36  ;;  %v1054_v63 = vsel %vm1050_vm3, %v2154_v0, %v2377_v15  ;;  %v1808_v0 = vld [vmem:[%s2151_s30 + $0xb8] sm:$0x3] }
  0xa3   : > { %v297_v36 = vld [vmem:[%s2151_s30 + $0xb8] sm:$0x3] }
  0xa4   : > { %v2386_v25 = vpop.permute.xlu1 %766  ;;  %v2388_v26 = vpop.permute.xlu0 %720 }
  0xa6   : > { %1016 = vrot.lane.b32.xlu1 %v645_v22, %s2081_s11  ;;  %874 = vrot.lane.b32.xlu0 %v643_v11, %s2078_s10  ;;  %v649_v22 = vrot.slane %v1805_v57, 2 }
  0xa8   : > { %v955_v32 = vpop.permute.xlu1 %954  ;;  %v909_v33 = vpop.permute.xlu0 %908  ;;  %v650_v30 = vsel %vm363_vm0, %v647_v46, %v649_v22 }
  0xa9   : > { %v1153_v50 = vsel %vm1152_vm9, %v1136_v44, %v955_v32  ;;  %v1137_v5 = vsel %vm1135_vm8, %v1120_v4, %v909_v33  ;;  %v2482_v44 = vld [vmem:[%s2151_s30 + $0xa8] sm:$0xff]  ;;  %v1071_v4 = vsel %vm1067_vm4, %v1054_v63, %v2388_v26 }
  0xaa   : > { %734 = vrot.lane.b32.xlu1 %v643_v11, %s2075_s7  ;;  %688 = vrot.lane.b32.xlu0 %v352_v29, %s2076_s8  ;;  %v294_v29 = vld [vmem:[%s2151_s30 + $0xa0] sm:$0x3] }
  0xab   : > { %v356_v32 = vrot.slane %v294_v29, 1 }
  0xac   : > { %v2404_v38 = vpop.permute.xlu1 %814  ;;  %v2406_v39 = vpop.permute.xlu0 %768 }
  0xad   : > { %v1088_v6 = vsel %vm1084_vm5, %v1071_v4, %v2406_v39  ;;  %v652_v39 = vrot.slane %v2492_v1, 2 }
  0xae   : > { %922 = vrot.lane.b32.xlu1 %v2399_v2, %s2079_s15  ;;  %876 = vrot.lane.b32.xlu0 %v519_v35, %s2078_s10  ;;  %v357_v35 = vsel %vm322_vm1, %v607_v49, %v356_v32  ;;  %v1087_v49 = vsel %vm1084_vm5, %v1070_v43, %v2386_v25  ;;  %v611_v25 = vrot.slane %v2482_v44, 1 }
  0xaf   : > { %v1104_v62 = vsel %vm1101_vm6, %v1087_v49, %v2404_v38 }
  0xb0   : > { %v1003_v3 = vpop.permute.xlu1 %1002  ;;  %v957_v51 = vpop.permute.xlu0 %956 }
  0xb1   : > { %v1170_v54 = vsel %vm1169_vm10, %v1153_v50, %v1003_v3  ;;  %v1154_v8 = vsel %vm1152_vm9, %v1137_v5, %v957_v51 }
  0xb2   : > { %782 = vrot.lane.b32.xlu1 %v2399_v2, %s2074_s6  ;;  %736 = vrot.lane.b32.xlu0 %v393_v47, %s2075_s7  ;;  %v397_v47 = vrot.slane %v294_v29, 2 }
  0xb3   : > { %1883 = vmatprep.mubr.msk.f32.mxu0 %vm1191_vm11, %v1170_v54  ;;  %v612_v54 = vrot.slane %v2492_v1, 1 }
  0xb4   : > { %v2433_v59 = vpop.permute.xlu1 %816  ;;  %v2435_v60 = vpop.permute.xlu0 %674  ;;  %v398_v52 = vsel %vm363_vm0, %v647_v46, %v397_v47 }
  0xb5   : > { %v613_v5 = vsel %vm322_vm1, %v611_v25, %v612_v54  ;;  %v1105_v15 = vsel %vm1101_vm6, %v1088_v6, %v2433_v59  ;;  %v1809_v25 = vld [vmem:[%s2151_s30 + $0xc0] sm:$0xff] }
  0xb6   : > { %970 = vrot.lane.b32.xlu1 %v608_v55, %s2080_s27  ;;  %924 = vrot.lane.b32.xlu0 %v2409_v40, %s2079_s15  ;;  %v616_v63 = vrot.slane %v1809_v25, 1 }
  0xb8   : > { %v1005_v10 = vpop.permute.xlu1 %1004  ;;  %v863_v11 = vpop.permute.xlu0 %862 }
  0xb9   : > { %v1171_v9 = vsel %vm1169_vm10, %v1154_v8, %v1005_v10  ;;  %v1121_v51 = vsel %vm1118_vm7, %v1104_v62, %v863_v11  ;;  %v651_v10 = vrot.slane %v2482_v44, 2  ;;  %v614_v11 = vrot.slane %v1808_v0, 1 }
  0xba   : > { %830 = vrot.lane.b32.xlu1 %v608_v55, %s2077_s9  ;;  %784 = vrot.lane.b32.xlu0 %v2409_v40, %s2074_s6 }
  0xbb   : > { %1884 = vmatmul.mubr.msk.f32.vlgmr.msra.gmra.mrb[0].mxu0 %vm1191_vm11, %v1171_v9  ;;  %v653_v17 = vsel %vm363_vm0, %v651_v10, %v652_v39 }
  0xbc   : > { %v2456_v18 = vpop.permute.xlu1 %722  ;;  %v2458_v19 = vpop.permute.xlu0 %676 }
  0xbe   : > { %1018 = vrot.lane.b32.xlu1 %v648_v13, %s2081_s11  ;;  %972 = vrot.lane.b32.xlu0 %v610_v16, %s2080_s27  ;;  %v1785_v16 = vld [vmem:[%s2151_s30 + $0xb8] sm:$0x3] }
  0xbf   : > { %v488_v22 = vrot.slane %v1785_v16, 1  ;;  %v528_v47 = vrot.slane %v1785_v16, 2 }
  0xc0   : > { %v911_v23 = vpop.permute.xlu1 %910  ;;  %v865_v27 = vpop.permute.xlu0 %864 }
  0xc1   : > { %v1138_v14 = vsel %vm1135_vm8, %v1121_v51, %v911_v23  ;;  %v1122_v8 = vsel %vm1118_vm7, %v1105_v15, %v865_v27  ;;  %v489_v29 = vsel %vm322_vm1, %v612_v54, %v488_v22  ;;  %v1055_v51 = vsel %vm1050_vm3, %v2199_v28, %v2435_v60 }
  0xc2   : > { %832 = vrot.lane.b32.xlu1 %v484_v20, %s2077_s9  ;;  %690 = vrot.lane.b32.xlu0 %v608_v55, %s2076_s8  ;;  %v615_v20 = vsel %vm322_vm1, %v612_v54, %v614_v11 }
  0xc4   : > { %v2467_v33 = vpop.permute.xlu1 %770  ;;  %v2469_v34 = vpop.permute.xlu0 %724 }
  0xc6   : > { %1020 = vrot.lane.b32.xlu1 %v650_v30, %s2081_s11  ;;  %878 = vrot.lane.b32.xlu0 %v648_v13, %s2078_s10  ;;  %v654_v30 = vrot.slane %v1808_v0, 2 }
  0xc8   : > { %v959_v37 = vpop.permute.xlu1 %958  ;;  %v913_v41 = vpop.permute.xlu0 %912 }
  0xc9   : > { %v1155_v55 = vsel %vm1152_vm9, %v1138_v14, %v959_v37  ;;  %v1139_v26 = vsel %vm1135_vm8, %v1122_v8, %v913_v41  ;;  %v655_v37 = vsel %vm363_vm0, %v652_v39, %v654_v30  ;;  %v361_v41 = vrot.slane %v297_v36, 1 }
  0xca   : > { %738 = vrot.lane.b32.xlu1 %v648_v13, %s2075_s7  ;;  %692 = vrot.lane.b32.xlu0 %v357_v35, %s2076_s8  ;;  %v1072_v14 = vsel %vm1067_vm4, %v1055_v51, %v2456_v18 }
  0xcc   : > { %v2487_v50 = vpop.permute.xlu1 %818  ;;  %v2489_v3 = vpop.permute.xlu0 %772 }
  0xce   : > { %926 = vrot.lane.b32.xlu1 %v2482_v44, %s2079_s15  ;;  %880 = vrot.lane.b32.xlu0 %v524_v45, %s2078_s10  ;;  %v362_v45 = vsel %vm322_vm1, %v612_v54, %v361_v41  ;;  %v1089_v54 = vsel %vm1084_vm5, %v1072_v14, %v2467_v33 }
  0xcf   : > { %v1106_v28 = vsel %vm1101_vm6, %v1089_v54, %v2487_v50  ;;  %v1056_v50 = vsel %vm1050_vm3, %v2203_v31, %v2458_v19  ;;  %v1811_v31 = vld [vmem:[%s2151_s30 + $0xd0] sm:$0x3] }
  0xd0   : > { %v1007_v56 = vpop.permute.xlu1 %1006  ;;  %v961_v38 = vpop.permute.xlu0 %960  ;;  %v1073_v8 = vsel %vm1067_vm4, %v1056_v50, %v2469_v34  ;;  %v619_v16 = vrot.slane %v1811_v31, 1  ;;  %v659_v41 = vrot.slane %v1811_v31, 2 }
  0xd1   : > { %v1172_v57 = vsel %vm1169_vm10, %v1155_v55, %v1007_v56  ;;  %v1156_v12 = vsel %vm1152_vm9, %v1139_v26, %v961_v38  ;;  %v402_v55 = vrot.slane %v297_v36, 2  ;;  %v1090_v10 = vsel %vm1084_vm5, %v1073_v8, %v2489_v3 }
  0xd2   : > { %786 = vrot.lane.b32.xlu1 %v2482_v44, %s2074_s6  ;;  %740 = vrot.lane.b32.xlu0 %v398_v52, %s2075_s7  ;;  %v529_v52 = vsel %vm363_vm0, %v652_v39, %v528_v47 }
  0xd3   : > { %1886 = vmatprep.mubr.msk.f32.mxu0 %vm1191_vm11, %v1172_v57  ;;  %v1810_v57 = vld [vmem:[%s2151_s30 + $0xc8] sm:$0xff]  ;;  %v403_v33 = vsel %vm363_vm0, %v652_v39, %v402_v55 }
  0xd4   : > { %v2518_v46 = vpop.permute.xlu1 %820  ;;  %v2520_v7 = vpop.permute.xlu0 %678  ;;  %v617_v4 = vrot.slane %v1810_v57, 1  ;;  %v1814_v55 = vld [vmem:[%s2151_s30 + $0xe8] sm:$0x3] }
  0xd5   : > { %v1107_v19 = vsel %vm1101_vm6, %v1090_v10, %v2518_v46 }
  0xd6   : > { %974 = vrot.lane.b32.xlu1 %v613_v5, %s2080_s27  ;;  %928 = vrot.lane.b32.xlu0 %v2492_v1, %s2079_s15  ;;  %v618_v26 = vsel %vm322_vm1, %v616_v63, %v617_v4  ;;  %v1057_v63 = vsel %vm1050_vm3, %v2255_v58, %v2520_v7 }
  0xd8   : > { %v1009_v9 = vpop.permute.xlu1 %1008  ;;  %v867_v13 = vpop.permute.xlu0 %866 }
  0xd9   : > { %v1173_v59 = vsel %vm1169_vm10, %v1156_v12, %v1009_v9  ;;  %v1123_v60 = vsel %vm1118_vm7, %v1106_v28, %v867_v13  ;;  %v656_v9 = vrot.slane %v1809_v25, 2  ;;  %v657_v13 = vrot.slane %v1810_v57, 2 }
  0xda   : > { %834 = vrot.lane.b32.xlu1 %v613_v5, %s2077_s9  ;;  %788 = vrot.lane.b32.xlu0 %v2492_v1, %s2074_s6  ;;  %v624_v28 = vrot.slane %v1814_v55, 1 }
  0xdb   : > { %1887 = vmatmul.mubr.msk.f32.gmra.mrb[2].mxu0 %vm1191_vm11, %v1173_v59  ;;  %v658_v46 = vsel %vm363_vm0, %v656_v9, %v657_v13 }
  0xdc   : > { %v2541_v23 = vpop.permute.xlu1 %726  ;;  %v2543_v27 = vpop.permute.xlu0 %680 }
  0xde   : > { %1022 = vrot.lane.b32.xlu1 %v653_v17, %s2081_s11  ;;  %976 = vrot.lane.b32.xlu0 %v615_v20, %s2080_s27  ;;  %v1788_v20 = vld [vmem:[%s2151_s30 + $0xd0] sm:$0x3] }
  0xdf   : > { %v493_v30 = vrot.slane %v1788_v20, 1 }
  0xe0   : > { %v915_v32 = vpop.permute.xlu1 %914  ;;  %v869_v35 = vpop.permute.xlu0 %868 }
  0xe1   : > { %v1140_v18 = vsel %vm1135_vm8, %v1123_v60, %v915_v32  ;;  %v1124_v12 = vsel %vm1118_vm7, %v1107_v19, %v869_v35  ;;  %v494_v36 = vsel %vm322_vm1, %v617_v4, %v493_v30 }
  0xe2   : > { %836 = vrot.lane.b32.xlu1 %v489_v29, %s2077_s9  ;;  %694 = vrot.lane.b32.xlu0 %v613_v5, %s2076_s8  ;;  %v620_v29 = vsel %vm322_vm1, %v617_v4, %v619_v16 }
  0xe4   : > { %v2552_v42 = vpop.permute.xlu1 %774  ;;  %v2554_v43 = vpop.permute.xlu0 %728 }
  0xe6   : > { %1024 = vrot.lane.b32.xlu1 %v655_v37, %s2081_s11  ;;  %882 = vrot.lane.b32.xlu0 %v653_v17, %s2078_s10  ;;  %v533_v37 = vrot.slane %v1788_v20, 2 }
  0xe8   : > { %v963_v49 = vpop.permute.xlu1 %962  ;;  %v917_v62 = vpop.permute.xlu0 %916 }
  0xe9   : > { %v1157_v5 = vsel %vm1152_vm9, %v1140_v18, %v963_v49  ;;  %v1141_v34 = vsel %vm1135_vm8, %v1124_v12, %v917_v62  ;;  %v534_v49 = vsel %vm363_vm0, %v657_v13, %v533_v37  ;;  %v660_v62 = vsel %vm363_vm0, %v657_v13, %v659_v41 }
  0xea   : > { %742 = vrot.lane.b32.xlu1 %v653_v17, %s2075_s7  ;;  %696 = vrot.lane.b32.xlu0 %v362_v45, %s2076_s8 }
  0xec   : > { %v2570_v56 = vpop.permute.xlu1 %822  ;;  %v2572_v38 = vpop.permute.xlu0 %776 }
  0xee   : > { %930 = vrot.lane.b32.xlu1 %v1809_v25, %s2079_s15  ;;  %884 = vrot.lane.b32.xlu0 %v529_v52, %s2078_s10  ;;  %v1812_v52 = vld [vmem:[%s2151_s30 + $0xd8] sm:$0xff] }
  0xef   : > { %v661_v4 = vrot.slane %v1812_v52, 2 }
  0xf0   : > { %v1011_v6 = vpop.permute.xlu1 %1010  ;;  %v965_v0 = vpop.permute.xlu0 %964 }
  0xf1   : > { %v1174_v15 = vsel %vm1169_vm10, %v1157_v5, %v1011_v6  ;;  %v1158_v3 = vsel %vm1152_vm9, %v1141_v34, %v965_v0  ;;  %v1074_v5 = vsel %vm1067_vm4, %v1057_v63, %v2541_v23 }
  0xf2   : > { %790 = vrot.lane.b32.xlu1 %v1809_v25, %s2074_s6  ;;  %744 = vrot.lane.b32.xlu0 %v403_v33, %s2075_s7  ;;  %v1813_v25 = vld [vmem:[%s2151_s30 + $0xe0] sm:$0xff]  ;;  %v1091_v50 = vsel %vm1084_vm5, %v1074_v5, %v2552_v42 }
  0xf3   : > { %1889 = vmatprep.mubr.msk.f32.mxu0 %vm1191_vm11, %v1174_v15  ;;  %v622_v54 = vrot.slane %v1813_v25, 1  ;;  %v662_v33 = vrot.slane %v1813_v25, 2  ;;  %v664_v15 = vrot.slane %v1814_v55, 2  ;;  %v1108_v58 = vsel %vm1101_vm6, %v1091_v50, %v2570_v56 }
  0xf4   : > { %v2595_v39 = vpop.permute.xlu1 %824  ;;  %v2597_v11 = vpop.permute.xlu0 %682  ;;  %v1058_v56 = vsel %vm1050_vm3, %v2259_v61, %v2543_v27 }
  0xf5   : > { %v625_v6 = vsel %vm322_vm1, %v622_v54, %v624_v28  ;;  %v665_v10 = vsel %vm363_vm0, %v662_v33, %v664_v15  ;;  %v663_v31 = vsel %vm363_vm0, %v661_v4, %v662_v33  ;;  %v1075_v9 = vsel %vm1067_vm4, %v1058_v56, %v2554_v43 }
  0xf6   : > { %978 = vrot.lane.b32.xlu1 %v618_v26, %s2080_s27  ;;  %932 = vrot.lane.b32.xlu0 %v1810_v57, %s2079_s15  ;;  %v1092_v13 = vsel %vm1084_vm5, %v1075_v9, %v2572_v38 }
  0xf8   : > { %v1013_v59 = vpop.permute.xlu1 %1012  ;;  %v871_v17 = vpop.permute.xlu0 %870 }
  0xf9   : > { %v1175_v22 = vsel %vm1169_vm10, %v1158_v3, %v1013_v59  ;;  %v1125_v7 = vsel %vm1118_vm7, %v1108_v58, %v871_v17  ;;  %v1109_v59 = vsel %vm1101_vm6, %v1092_v13, %v2595_v39 }
  0xfa   : > { %838 = vrot.lane.b32.xlu1 %v618_v26, %s2077_s9  ;;  %792 = vrot.lane.b32.xlu0 %v1810_v57, %s2074_s6  ;;  %v621_v57 = vrot.slane %v1812_v52, 1 }
  0xfb   : > { %1890 = vmatmul.mubr.msk.f32.gmra.mrb[4].mxu0 %vm1191_vm11, %v1175_v22 }
  0xfc   : > { %v2614_v32 = vpop.permute.xlu1 %730  ;;  %v2616_v35 = vpop.permute.xlu0 %684  ;;  %v623_v0 = vsel %vm322_vm1, %v621_v57, %v622_v54 }
  0xfe   : > { %1026 = vrot.lane.b32.xlu1 %v658_v46, %s2081_s11  ;;  %980 = vrot.lane.b32.xlu0 %v620_v29, %s2080_s27 }
 0x100   : > { %v919_v45 = vpop.permute.xlu1 %918  ;;  %v873_v47 = vpop.permute.xlu0 %872 }
 0x101   : > { %v1142_v23 = vsel %vm1135_vm8, %v1125_v7, %v919_v45  ;;  %v1126_v17 = vsel %vm1118_vm7, %v1109_v59, %v873_v47  ;;  %v1059_v45 = vsel %vm1050_vm3, %v2296_v21, %v2597_v11  ;;  %v1060_v21 = vsel %vm1050_vm3, %v2300_v24, %v2616_v35 }
 0x102   : > { %886 = vrot.lane.b32.xlu1 %v658_v46, %s2078_s10  ;;  %840 = vrot.lane.b32.xlu0 %v494_v36, %s2077_s9  ;;  %v1076_v47 = vsel %vm1067_vm4, %v1059_v45, %v2614_v32  ;;  %s1755_s9 = sshll.u32 %s2056_s18, 3  ;;  %s2894_s18 = smov (!%p265_p7, %s2056_s18), 1 }
 0x103   : > { %p255_p6 = scmp.lt.s32.totalorder %s1755_s9, 15  ;;  %s268_s26 = sadd.s32 %s1759_s25, %s2894_s18 }
 0x104   : > { %v779_v51 = vpop.permute.xlu1 %778  ;;  %v2625_v14 = vpop.permute.xlu0 %732 }
 0x105   : > { %v1077_v11 = vsel %vm1067_vm4, %v1060_v21, %v2625_v14  ;;  %s2892_s9 = smov (!%p255_p6, %s1755_s9), 15 }
 0x106   : > { %888 = vrot.lane.b32.xlu1 %v534_v49, %s2078_s10  ;;  %1028 = vrot.lane.b32.xlu0 %v660_v62, %s2081_s11  ;;  %v1093_v49 = vsel %vm1084_vm5, %v1076_v47, %v779_v51  ;;  %s1756_s10 = sshll.u32 %s2892_s9, 1 }
 0x107   : > { %s259_s13 = sadd.s32 %s1757_s12, %s1756_s10 }
 0x108   : > { %v967_v60 = vpop.permute.xlu1 %966  ;;  %v921_v18 = vpop.permute.xlu0 %920  ;;  %s1758_s14 = sshll.u32 %s259_s13, 3 }
 0x109   : > { %v1159_v19 = vsel %vm1152_vm9, %v1142_v23, %v967_v60  ;;  %v1143_v61 = vsel %vm1135_vm8, %v1126_v17, %v921_v18  ;;  %s2773_s17 = scalar_lea.vmem %s2877_s4, %s1758_s14 }
 0x10a   : > { %936 = vrot.lane.b32.xlu1 %v1813_v25, %s2079_s15  ;;  %934 = vrot.lane.b32.xlu0 %v1812_v52, %s2079_s15 }
 0x10c   : > { %v827_v8 = vpop.permute.xlu1 %826  ;;  %v781_v26 = vpop.permute.xlu0 %780 }
 0x10d   : > { %v1110_v52 = vsel %vm1101_vm6, %v1093_v49, %v827_v8  ;;  %v1094_v32 = vsel %vm1084_vm5, %v1077_v11, %v781_v26 }
 0x10e   : > { %984 = vrot.lane.b32.xlu1 %v625_v6, %s2080_s27  ;;  %982 = vrot.lane.b32.xlu0 %v623_v0, %s2080_s27  ;;  %s1760_s27 = sshll.u32 %s268_s26, 3 }
 0x110   : > { %v1015_v42 = vpop.permute.xlu1 %1014  ;;  %v969_v12 = vpop.permute.xlu0 %968 }
 0x111   : > { %v1176_v34 = vsel %vm1169_vm10, %v1159_v19, %v1015_v42  ;;  %v1160_v27 = vsel %vm1152_vm9, %v1143_v61, %v969_v12 }
 0x112   : > { %1032 = vrot.lane.b32.xlu1 %v665_v10, %s2081_s11  ;;  %1030 = vrot.lane.b32.xlu0 %v663_v31, %s2081_s11  ;;  %s270_s11 = scalar_lea.vmem %s2878_s5, %s1760_s27 }
 0x113   : > { %1892 = vmatprep.mubr.msk.f32.mxu0 %vm1191_vm11, %v1176_v34 }
 0x114   : > { %v829_v16 = vpop.permute.xlu1 %828  ;;  %v687_v3 = vpop.permute.xlu0 %686 }
 0x115   : > { %v1111_v33 = vsel %vm1101_vm6, %v1094_v32, %v829_v16  ;;  %v1061_v10 = vsel %vm1050_vm3, %v2341_v48, %v687_v3 }
 0x118   : > { %v1017_v20 = vpop.permute.xlu1 %1016  ;;  %v875_v22 = vpop.permute.xlu0 %874 }
 0x119   : > { %v1177_v43 = vsel %vm1169_vm10, %v1160_v27, %v1017_v20  ;;  %v1127_v55 = vsel %vm1118_vm7, %v1110_v52, %v875_v22 }
 0x11a   : > { %1893 = vmatmul.mubr.msk.f32.gmra.mrb[6].mxu0 %vm1191_vm11, %v1177_v43 }
 0x11c   : > { %v735_v46 = vpop.permute.xlu1 %734  ;;  %v689_v29 = vpop.permute.xlu0 %688 }
 0x11d   : > { %v1078_v31 = vsel %vm1067_vm4, %v1061_v10, %v735_v46  ;;  %v1062_v48 = vsel %vm1050_vm3, %v2345_v53, %v689_v29 }
 0x120   : > { %v923_v38 = vpop.permute.xlu1 %922  ;;  %v877_v30 = vpop.permute.xlu0 %876 }
 0x121   : > { %v1144_v54 = vsel %vm1135_vm8, %v1127_v55, %v923_v38  ;;  %v1128_v4 = vsel %vm1118_vm7, %v1111_v33, %v877_v30 }
 0x124   : > { %v783_v36 = vpop.permute.xlu1 %782  ;;  %v737_v37 = vpop.permute.xlu0 %736 }
 0x125   : > { %v1095_v19 = vsel %vm1084_vm5, %v1078_v31, %v783_v36  ;;  %v1079_v3 = vsel %vm1067_vm4, %v1062_v48, %v737_v37 }
 0x128   : > { %v971_v41 = vpop.permute.xlu1 %970  ;;  %v925_v39 = vpop.permute.xlu0 %924 }
 0x129   : > { %v1161_v57 = vsel %vm1152_vm9, %v1144_v54, %v971_v41  ;;  %v1145_v5 = vsel %vm1135_vm8, %v1128_v4, %v925_v39 }
 0x12c   : > { %v831_v62 = vpop.permute.xlu1 %830  ;;  %v785_v25 = vpop.permute.xlu0 %784 }
 0x12d   : > { %v1112_v34 = vsel %vm1101_vm6, %v1095_v19, %v831_v62  ;;  %v1096_v61 = vsel %vm1084_vm5, %v1079_v3, %v785_v25 }
 0x130   : > { %v1019_v28 = vpop.permute.xlu1 %1018  ;;  %v973_v60 = vpop.permute.xlu0 %972 }
 0x131   : > { %v1178_v18 = vsel %vm1169_vm10, %v1161_v57, %v1019_v28  ;;  %v1162_v6 = vsel %vm1152_vm9, %v1145_v5, %v973_v60 }
 0x132   : > { %1895 = vmatprep.mubr.msk.f32.mxu1 %vm1191_vm11, %v1178_v18 }
 0x134   : > { %v833_v51 = vpop.permute.xlu1 %832  ;;  %v691_v63 = vpop.permute.xlu0 %690 }
 0x135   : > { %v1113_v22 = vsel %vm1101_vm6, %v1096_v61, %v833_v51  ;;  %v1063_v25 = vsel %vm1050_vm3, %v2399_v2, %v691_v63  ;;  %v2757_v61 = vld [vmem:[%s2875_s2] ss:$0 sm:$0xff] }
 0x138   : > { %v1021_v0 = vpop.permute.xlu1 %1020  ;;  %v879_v15 = vpop.permute.xlu0 %878 }
 0x139   : > { %v1179_v24 = vsel %vm1169_vm10, %v1162_v6, %v1021_v0  ;;  %v1129_v56 = vsel %vm1118_vm7, %v1112_v34, %v879_v15 }
 0x13a   : > { %1896 = vmatmul.mubr.msk.f32.vlgmr.msra.gmra.mrb[0].mxu1 %vm1191_vm11, %v1179_v24 }
 0x13c   : > { %v739_v35 = vpop.permute.xlu1 %738  ;;  %v693_v14 = vpop.permute.xlu0 %692 }
 0x13d   : > { %v1080_v52 = vsel %vm1067_vm4, %v1063_v25, %v739_v35  ;;  %v1064_v2 = vsel %vm1050_vm3, %v2409_v40, %v693_v14 }
 0x140   : > { %v927_v50 = vpop.permute.xlu1 %926  ;;  %v881_v8 = vpop.permute.xlu0 %880 }
 0x141   : > { %v1146_v9 = vsel %vm1135_vm8, %v1129_v56, %v927_v50  ;;  %v1130_v43 = vsel %vm1118_vm7, %v1113_v22, %v881_v8 }
 0x144   : > { %v787_v26 = vpop.permute.xlu1 %786  ;;  %v741_v58 = vpop.permute.xlu0 %740 }
 0x145   : > { %v1097_v55 = vsel %vm1084_vm5, %v1080_v52, %v787_v26  ;;  %v1081_v63 = vsel %vm1067_vm4, %v1064_v2, %v741_v58 }
 0x148   : > { %v975_v7 = vpop.permute.xlu1 %974  ;;  %v929_v23 = vpop.permute.xlu0 %928 }
 0x149   : > { %v1163_v13 = vsel %vm1152_vm9, %v1146_v9, %v975_v7  ;;  %v1147_v46 = vsel %vm1135_vm8, %v1130_v43, %v929_v23 }
 0x14c   : > { %v835_v42 = vpop.permute.xlu1 %834  ;;  %v789_v12 = vpop.permute.xlu0 %788 }
 0x14d   : > { %v1114_v28 = vsel %vm1101_vm6, %v1097_v55, %v835_v42  ;;  %v1098_v33 = vsel %vm1084_vm5, %v1081_v63, %v789_v12 }
 0x150   : > { %v1023_v16 = vpop.permute.xlu1 %1022  ;;  %v977_v59 = vpop.permute.xlu0 %976 }
 0x151   : > { %v1180_v17 = vsel %vm1169_vm10, %v1163_v13, %v1023_v16  ;;  %v1164_v38 = vsel %vm1152_vm9, %v1147_v46, %v977_v59 }
 0x152   : > { %1898 = vmatprep.mubr.msk.f32.mxu1 %vm1191_vm11, %v1180_v17 }
 0x154   : > { %v837_v27 = vpop.permute.xlu1 %836  ;;  %v695_v20 = vpop.permute.xlu0 %694 }
 0x155   : > { %v1115_v6 = vsel %vm1101_vm6, %v1098_v33, %v837_v27  ;;  %v1065_v26 = vsel %vm1050_vm3, %v2482_v44, %v695_v20  ;;  %v2762_v20 = vld [vmem:[%s2876_s3] ss:$0 sm:$0xff] }
 0x158   : > { %v1025_v30 = vpop.permute.xlu1 %1024  ;;  %v883_v36 = vpop.permute.xlu0 %882 }
 0x159   : > { %v1181_v53 = vsel %vm1169_vm10, %v1164_v38, %v1025_v30  ;;  %v1131_v60 = vsel %vm1118_vm7, %v1114_v28, %v883_v36 }
 0x15a   : > { %1899 = vmatmul.mubr.msk.f32.gmra.mrb[2].mxu1 %vm1191_vm11, %v1181_v53 }
 0x15c   : > { %v743_v29 = vpop.permute.xlu1 %742  ;;  %v697_v37 = vpop.permute.xlu0 %696 }
 0x15d   : > { %v1066_v58 = vsel %vm1050_vm3, %v2492_v1, %v697_v37  ;;  %v1082_v7 = vsel %vm1067_vm4, %v1065_v26, %v743_v29 }
 0x160   : > { %v931_v41 = vpop.permute.xlu1 %930  ;;  %v885_v39 = vpop.permute.xlu0 %884 }
 0x161   : > { %v1148_v18 = vsel %vm1135_vm8, %v1131_v60, %v931_v41  ;;  %v1132_v0 = vsel %vm1118_vm7, %v1115_v6, %v885_v39 }
 0x164   : > { %v791_v45 = vpop.permute.xlu1 %790  ;;  %v745_v47 = vpop.permute.xlu0 %744 }
 0x165   : > { %v1083_v23 = vsel %vm1067_vm4, %v1066_v58, %v745_v47  ;;  %v1099_v10 = vsel %vm1084_vm5, %v1082_v7, %v791_v45 }
 0x168   : > { %v979_v49 = vpop.permute.xlu1 %978  ;;  %v933_v62 = vpop.permute.xlu0 %932 }
 0x169   : > { %v1165_v21 = vsel %vm1152_vm9, %v1148_v18, %v979_v49  ;;  %v1149_v15 = vsel %vm1135_vm8, %v1132_v0, %v933_v62 }
 0x16c   : > { %v839_v54 = vpop.permute.xlu1 %838  ;;  %v793_v57 = vpop.permute.xlu0 %792 }
 0x16d   : > { %v1100_v31 = vsel %vm1084_vm5, %v1083_v23, %v793_v57  ;;  %v1116_v12 = vsel %vm1101_vm6, %v1099_v10, %v839_v54 }
 0x170   : > { %v1027_v11 = vpop.permute.xlu1 %1026  ;;  %v981_v32 = vpop.permute.xlu0 %980 }
 0x171   : > { %v1182_v51 = vsel %vm1169_vm10, %v1165_v21, %v1027_v11  ;;  %v1166_v24 = vsel %vm1152_vm9, %v1149_v15, %v981_v32 }
 0x172   : > { %1901 = vmatprep.mubr.msk.f32.mxu1 %vm1191_vm11, %v1182_v51 }
 0x174   : > { %v887_v4 = vpop.permute.xlu1 %886  ;;  %v841_v5 = vpop.permute.xlu0 %840 }
 0x175   : > { %v1117_v34 = vsel %vm1101_vm6, %v1100_v31, %v841_v5  ;;  %v1133_v56 = vsel %vm1118_vm7, %v1116_v12, %v887_v4 }
 0x178   : > { %v889_v35 = vpop.permute.xlu1 %888  ;;  %v1029_v50 = vpop.permute.xlu0 %1028 }
 0x179   : > { %v1183_v40 = vsel %vm1169_vm10, %v1166_v24, %v1029_v50  ;;  %v1134_v44 = vsel %vm1118_vm7, %v1117_v34, %v889_v35 }
 0x17a   : > { %1902 = vmatmul.mubr.msk.f32.gmra.mrb[4].mxu1 %vm1191_vm11, %v1183_v40 }
 0x17c   : > { %v937_v14 = vpop.permute.xlu1 %936  ;;  %v935_v8 = vpop.permute.xlu0 %934 }
 0x17d   : > { %v1151_v1 = vsel %vm1135_vm8, %v1134_v44, %v937_v14  ;;  %v1150_v9 = vsel %vm1135_vm8, %v1133_v56, %v935_v8 }
 0x180   : > { %v985_v19 = vpop.permute.xlu1 %984  ;;  %v983_v42 = vpop.permute.xlu0 %982 }
 0x181   : > { %v1168_v13 = vsel %vm1152_vm9, %v1151_v1, %v985_v19  ;;  %v1167_v16 = vsel %vm1152_vm9, %v1150_v9, %v983_v42 }
 0x184   : > { %v1033_v59 = vpop.permute.xlu1 %1032  ;;  %v1031_v17 = vpop.permute.xlu0 %1030 }
 0x185   : > { %v1185_v48 = vsel %vm1169_vm10, %v1168_v13, %v1033_v59  ;;  %v1184_v3 = vsel %vm1169_vm10, %v1167_v16, %v1031_v17 }
 0x186   : > { %1904 = vmatprep.mubr.msk.f32.mxu1 %vm1191_vm11, %v1184_v3 }
 0x187   : > { %1905 = vmatmul.mubr.msk.f32.gmra.mrb[6].mxu1 %vm1191_vm11, %v1185_v48 }
 0x18e   : > { %v1885_v27 = vpop.f32.mrb[0].mxu0 }
 0x18f   : > { %v1397_v22 = vmul.f32 %v1885_v27, %v2757_v61  ;;  %v1310_v43 = vpop.f32.mrb[1].mxu0 }
 0x190   : > { %v1396_v46 = vmul.f32 %v2757_v61, %v1310_v43 }
 0x191   : > { %v1420_v38 = vadd.f32 %v2762_v20, %v1397_v22 }
 0x192   : > { %v1419_v30 = vadd.f32 %v2762_v20, %v1396_v46 }
 0x193   : > { %v1835_v36 = vmul.f32 -1.442695, %v1420_v38 }
 0x194   : > { %v1834_v53 = vmul.f32 -1.442695, %v1419_v30 }
 0x195   : > { %1970 = vpow2.f32 %v1835_v36 }
 0x196   : > { %1972 = vpow2.f32 %v1834_v53 }
 0x19f   : > { %v1971_v29 = vpop.eup %1970 }
 0x1a0   : > { %v1973_v37 = vpop.eup %1972  ;;  %v1484_v41 = vadd.f32 1.0, %v1971_v29 }
 0x1a1   : > { %v1483_v39 = vadd.f32 1.0, %v1973_v37 }
 0x1a2   : > { %1974 = vrcp.f32 %v1484_v41 }
 0x1a3   : > { %1976 = vrcp.f32 %v1483_v39 }
 0x1ac   : > { %v1975_v45 = vpop.eup %1974 }
 0x1ad   : > { %v1977_v47 = vpop.eup %1976  ;;  %v1532_v49 = vmul.f32 %v1975_v45, %v1420_v38 }
 0x1ae   : > { %v1531_v62 = vmul.f32 %v1977_v47, %v1419_v30  ;;  %v1888_v25 = vpop.f32.mrb[2].mxu0 }
 0x1af   : > { %1549 = vst.msk [vmem:[%s2773_s17 + $0x8] sm:$0xff] %vm1547_vm12, %v1532_v49  ;;  %v1565_v52 = vsel %vm1547_vm12, %v1532_v49, 0.0  ;;  %v1399_v55 = vmul.f32 %v1888_v25, %v2757_v61  ;;  %v1320_v54 = vpop.f32.mrb[3].mxu0 }
 0x1b0   : > { %1548 = vst.msk [vmem:[%s2773_s17] sm:$0xff] %vm1547_vm12, %v1531_v62  ;;  %v1564_v57 = vsel %vm1547_vm12, %v1531_v62, 0.0  ;;  %v1398_v28 = vmul.f32 %v2757_v61, %v1320_v54 }
 0x1b1   : > { %v1566_v60 = vadd.f32 %v1565_v52, %v1564_v57  ;;  %v1422_v18 = vadd.f32 %v2762_v20, %v1399_v55 }
 0x1b2   : > { %v1421_v21 = vadd.f32 %v2762_v20, %v1398_v28 }
 0x1b3   : > { %v1837_v11 = vmul.f32 -1.442695, %v1422_v18 }
 0x1b4   : > { %v1836_v32 = vmul.f32 -1.442695, %v1421_v21 }
 0x1b5   : > { %1978 = vpow2.f32 %v1837_v11 }
 0x1b6   : > { %1980 = vpow2.f32 %v1836_v32 }
 0x1bf   : > { %v1979_v51 = vpop.eup %1978 }
 0x1c0   : > { %v1981_v2 = vpop.eup %1980  ;;  %v1486_v63 = vadd.f32 1.0, %v1979_v51 }
 0x1c1   : > { %v1485_v33 = vadd.f32 1.0, %v1981_v2 }
 0x1c2   : > { %1982 = vrcp.f32 %v1486_v63 }
 0x1c3   : > { %1984 = vrcp.f32 %v1485_v33 }
 0x1cc   : > { %v1983_v4 = vpop.eup %1982 }
 0x1cd   : > { %v1985_v5 = vpop.eup %1984  ;;  %v1534_v6 = vmul.f32 %v1983_v4, %v1422_v18 }
 0x1ce   : > { %v1533_v0 = vmul.f32 %v1985_v5, %v1421_v21  ;;  %v1891_v15 = vpop.f32.mrb[4].mxu0 }
 0x1cf   : > { %1551 = vst.msk [vmem:[%s2773_s17 + $0x18] sm:$0xff] %vm1547_vm12, %v1534_v6  ;;  %v1401_v24 = vmul.f32 %v1891_v15, %v2757_v61  ;;  %v1330_v35 = vpop.f32.mrb[5].mxu0  ;;  %v1569_v26 = vsel %vm1547_vm12, %v1534_v6, 0.0 }
 0x1d0   : > { %1550 = vst.msk [vmem:[%s2773_s17 + $0x10] sm:$0xff] %vm1547_vm12, %v1533_v0  ;;  %v1567_v50 = vsel %vm1547_vm12, %v1533_v0, 0.0  ;;  %v1400_v40 = vmul.f32 %v2757_v61, %v1330_v35 }
 0x1d1   : > { %v1568_v14 = vadd.f32 %v1567_v50, %v1566_v60  ;;  %v1424_v8 = vadd.f32 %v2762_v20, %v1401_v24 }
 0x1d2   : > { %v1423_v58 = vadd.f32 %v2762_v20, %v1400_v40 }
 0x1d3   : > { %v1839_v7 = vmul.f32 -1.442695, %v1424_v8  ;;  %v1570_v23 = vadd.f32 %v1569_v26, %v1568_v14 }
 0x1d4   : > { %v1838_v10 = vmul.f32 -1.442695, %v1423_v58 }
 0x1d5   : > { %1986 = vpow2.f32 %v1839_v7 }
 0x1d6   : > { %1988 = vpow2.f32 %v1838_v10 }
 0x1df   : > { %v1987_v31 = vpop.eup %1986 }
 0x1e0   : > { %v1989_v19 = vpop.eup %1988  ;;  %v1488_v42 = vadd.f32 1.0, %v1987_v31 }
 0x1e1   : > { %v1487_v12 = vadd.f32 1.0, %v1989_v19 }
 0x1e2   : > { %1990 = vrcp.f32 %v1488_v42 }
 0x1e3   : > { %1992 = vrcp.f32 %v1487_v12 }
 0x1ec   : > { %v1991_v34 = vpop.eup %1990 }
 0x1ed   : > { %v1993_v56 = vpop.eup %1992  ;;  %v1536_v44 = vmul.f32 %v1991_v34, %v1424_v8  ;;  %v1894_v1 = vpop.f32.mrb[6].mxu0 }
 0x1ee   : > { %v1535_v9 = vmul.f32 %v1993_v56, %v1423_v58  ;;  %v1403_v13 = vmul.f32 %v1894_v1, %v2757_v61  ;;  %v1340_v16 = vpop.f32.mrb[7].mxu0 }
 0x1ef   : > { %1553 = vst.msk [vmem:[%s2773_s17 + $0x28] sm:$0xff] %vm1547_vm12, %v1536_v44  ;;  %v1402_v59 = vmul.f32 %v2757_v61, %v1340_v16  ;;  %v1573_v22 = vsel %vm1547_vm12, %v1536_v44, 0.0 }
 0x1f0   : > { %1552 = vst.msk [vmem:[%s2773_s17 + $0x20] sm:$0xff] %vm1547_vm12, %v1535_v9  ;;  %v1571_v17 = vsel %vm1547_vm12, %v1535_v9, 0.0  ;;  %v1426_v48 = vadd.f32 %v2762_v20, %v1403_v13 }
 0x1f1   : > { %v1572_v3 = vadd.f32 %v1571_v17, %v1570_v23  ;;  %v1425_v27 = vadd.f32 %v2762_v20, %v1402_v59 }
 0x1f2   : > { %v1841_v43 = vmul.f32 -1.442695, %v1426_v48 }
 0x1f3   : > { %v1840_v46 = vmul.f32 -1.442695, %v1425_v27  ;;  %v1574_v38 = vadd.f32 %v1573_v22, %v1572_v3 }
 0x1f4   : > { %1994 = vpow2.f32 %v1841_v43 }
 0x1f5   : > { %1996 = vpow2.f32 %v1840_v46 }
 0x1fe   : > { %v1995_v30 = vpop.eup %1994 }
 0x1ff   : > { %v1997_v36 = vpop.eup %1996  ;;  %v1490_v53 = vadd.f32 1.0, %v1995_v30 }
 0x200   : > { %v1489_v29 = vadd.f32 1.0, %v1997_v36 }
 0x201   : > { %1998 = vrcp.f32 %v1490_v53 }
 0x202   : > { %2000 = vrcp.f32 %v1489_v29 }
 0x20b   : > { %v1999_v37 = vpop.eup %1998 }
 0x20c   : > { %v2001_v41 = vpop.eup %2000  ;;  %v1538_v39 = vmul.f32 %v1999_v37, %v1426_v48 }
 0x20d   : > { %v1537_v45 = vmul.f32 %v2001_v41, %v1425_v27  ;;  %v1897_v47 = vpop.f32.mrb[0].mxu1 }
 0x20e   : > { %1555 = vst.msk [vmem:[%s2773_s17 + $0x38] sm:$0xff] %vm1547_vm12, %v1538_v39  ;;  %v1405_v49 = vmul.f32 %v1897_v47, %v2757_v61  ;;  %v1350_v62 = vpop.f32.mrb[1].mxu1  ;;  %v1577_v57 = vsel %vm1547_vm12, %v1538_v39, 0.0 }
 0x20f   : > { %1554 = vst.msk [vmem:[%s2773_s17 + $0x30] sm:$0xff] %vm1547_vm12, %v1537_v45  ;;  %v1575_v25 = vsel %vm1547_vm12, %v1537_v45, 0.0  ;;  %v1404_v52 = vmul.f32 %v2757_v61, %v1350_v62 }
 0x210   : > { %v1576_v55 = vadd.f32 %v1575_v25, %v1574_v38  ;;  %v1428_v54 = vadd.f32 %v2762_v20, %v1405_v49 }
 0x211   : > { %v1427_v28 = vadd.f32 %v2762_v20, %v1404_v52 }
 0x212   : > { %v1843_v60 = vmul.f32 -1.442695, %v1428_v54  ;;  %v1578_v18 = vadd.f32 %v1577_v57, %v1576_v55 }
 0x213   : > { %v1842_v21 = vmul.f32 -1.442695, %v1427_v28 }
 0x214   : > { %2002 = vpow2.f32 %v1843_v60 }
 0x215   : > { %2004 = vpow2.f32 %v1842_v21 }
 0x21e   : > { %v2003_v11 = vpop.eup %2002 }
 0x21f   : > { %v2005_v32 = vpop.eup %2004  ;;  %v1492_v51 = vadd.f32 1.0, %v2003_v11 }
 0x220   : > { %v1491_v2 = vadd.f32 1.0, %v2005_v32 }
 0x221   : > { %2006 = vrcp.f32 %v1492_v51 }
 0x222   : > { %2008 = vrcp.f32 %v1491_v2 }
 0x22b   : > { %v2007_v63 = vpop.eup %2006 }
 0x22c   : > { %v2009_v33 = vpop.eup %2008  ;;  %v1540_v4 = vmul.f32 %v2007_v63, %v1428_v54 }
 0x22d   : > { %v1539_v5 = vmul.f32 %v2009_v33, %v1427_v28  ;;  %v1900_v6 = vpop.f32.mrb[2].mxu1 }
 0x22e   : > { %1557 = vst.msk [vmem:[%s2773_s17 + $0x48] sm:$0xff] %vm1547_vm12, %v1540_v4  ;;  %v1407_v0 = vmul.f32 %v1900_v6, %v2757_v61  ;;  %v1360_v15 = vpop.f32.mrb[3].mxu1  ;;  %v1581_v14 = vsel %vm1547_vm12, %v1540_v4, 0.0 }
 0x22f   : > { %1556 = vst.msk [vmem:[%s2773_s17 + $0x40] sm:$0xff] %vm1547_vm12, %v1539_v5  ;;  %v1579_v24 = vsel %vm1547_vm12, %v1539_v5, 0.0  ;;  %v1406_v35 = vmul.f32 %v2757_v61, %v1360_v15 }
 0x230   : > { %v1580_v50 = vadd.f32 %v1579_v24, %v1578_v18  ;;  %v1430_v40 = vadd.f32 %v2762_v20, %v1407_v0 }
 0x231   : > { %v1429_v8 = vadd.f32 %v2762_v20, %v1406_v35 }
 0x232   : > { %v1845_v26 = vmul.f32 -1.442695, %v1430_v40  ;;  %v1582_v58 = vadd.f32 %v1581_v14, %v1580_v50 }
 0x233   : > { %v1844_v7 = vmul.f32 -1.442695, %v1429_v8 }
 0x234   : > { %2010 = vpow2.f32 %v1845_v26 }
 0x235   : > { %2012 = vpow2.f32 %v1844_v7 }
 0x23e   : > { %v2011_v23 = vpop.eup %2010 }
 0x23f   : > { %v2013_v10 = vpop.eup %2012  ;;  %v1494_v31 = vadd.f32 1.0, %v2011_v23 }
 0x240   : > { %v1493_v19 = vadd.f32 1.0, %v2013_v10 }
 0x241   : > { %2014 = vrcp.f32 %v1494_v31 }
 0x242   : > { %2016 = vrcp.f32 %v1493_v19 }
 0x24b   : > { %v2015_v42 = vpop.eup %2014 }
 0x24c   : > { %v2017_v12 = vpop.eup %2016  ;;  %v1542_v34 = vmul.f32 %v2015_v42, %v1430_v40 }
 0x24d   : > { %v1541_v56 = vmul.f32 %v2017_v12, %v1429_v8  ;;  %v1903_v44 = vpop.f32.mrb[4].mxu1 }
 0x24e   : > { %1559 = vst.msk [vmem:[%s2773_s17 + $0x58] sm:$0xff] %vm1547_vm12, %v1542_v34  ;;  %v1409_v1 = vmul.f32 %v1903_v44, %v2757_v61  ;;  %v1370_v9 = vpop.f32.mrb[5].mxu1  ;;  %v1585_v48 = vsel %vm1547_vm12, %v1542_v34, 0.0 }
 0x24f   : > { %1558 = vst.msk [vmem:[%s2773_s17 + $0x50] sm:$0xff] %vm1547_vm12, %v1541_v56  ;;  %v1583_v13 = vsel %vm1547_vm12, %v1541_v56, 0.0  ;;  %v1408_v16 = vmul.f32 %v2757_v61, %v1370_v9 }
 0x250   : > { %v1584_v59 = vadd.f32 %v1583_v13, %v1582_v58  ;;  %v1432_v17 = vadd.f32 %v2762_v20, %v1409_v1 }
 0x251   : > { %v1431_v3 = vadd.f32 %v2762_v20, %v1408_v16 }
 0x252   : > { %v1847_v27 = vmul.f32 -1.442695, %v1432_v17  ;;  %v1586_v22 = vadd.f32 %v1585_v48, %v1584_v59 }
 0x253   : > { %v1846_v43 = vmul.f32 -1.442695, %v1431_v3 }
 0x254   : > { %2018 = vpow2.f32 %v1847_v27 }
 0x255   : > { %2020 = vpow2.f32 %v1846_v43 }
 0x25a   : > { %v1906_v46 = vpop.f32.mrb[6].mxu1 }
 0x25b   : > { %v1411_v38 = vmul.f32 %v1906_v46, %v2757_v61  ;;  %v1380_v30 = vpop.f32.mrb[7].mxu1 }
 0x25c   : > { %v1410_v36 = vmul.f32 %v2757_v61, %v1380_v30 }
 0x25d   : > { %v1434_v53 = vadd.f32 %v2762_v20, %v1411_v38 }
 0x25e   : > { %v2019_v29 = vpop.eup %2018  ;;  %v1433_v37 = vadd.f32 %v2762_v20, %v1410_v36 }
 0x25f   : > { %v2021_v41 = vpop.eup %2020  ;;  %v1496_v39 = vadd.f32 1.0, %v2019_v29  ;;  %v1849_v45 = vmul.f32 -1.442695, %v1434_v53 }
 0x260   : > { %v1495_v47 = vadd.f32 1.0, %v2021_v41  ;;  %v1848_v49 = vmul.f32 -1.442695, %v1433_v37 }
 0x261   : > { %2022 = vrcp.f32 %v1496_v39 }
 0x262   : > { %2024 = vrcp.f32 %v1495_v47 }
 0x263   : > { %2026 = vpow2.f32 %v1849_v45 }
 0x264   : > { %2028 = vpow2.f32 %v1848_v49 }
 0x26b   : > { %v2023_v62 = vpop.eup %2022 }
 0x26c   : > { %v2025_v25 = vpop.eup %2024  ;;  %v1544_v52 = vmul.f32 %v2023_v62, %v1432_v17 }
 0x26d   : > { %v2027_v61 = vpop.eup %2026  ;;  %v1543_v55 = vmul.f32 %v2025_v25, %v1431_v3 }
 0x26e   : > { %v2029_v54 = vpop.eup %2028  ;;  %1561 = vst.msk [vmem:[%s2773_s17 + $0x68] sm:$0xff] %vm1547_vm12, %v1544_v52  ;;  %v1498_v20 = vadd.f32 1.0, %v2027_v61  ;;  %v1589_v18 = vsel %vm1547_vm12, %v1544_v52, 0.0 }
 0x26f   : > { %1560 = vst.msk [vmem:[%s2773_s17 + $0x60] sm:$0xff] %vm1547_vm12, %v1543_v55  ;;  %v1587_v57 = vsel %vm1547_vm12, %v1543_v55, 0.0  ;;  %v1497_v28 = vadd.f32 1.0, %v2029_v54 }
 0x270   : > { %v1588_v60 = vadd.f32 %v1587_v57, %v1586_v22  ;;  %2030 = vrcp.f32 %v1498_v20 }
 0x271   : > { %2032 = vrcp.f32 %v1497_v28 }
 0x272   : > { %v1590_v21 = vadd.f32 %v1589_v18, %v1588_v60 }
 0x27a   : > { %v2031_v11 = vpop.eup %2030 }
 0x27b   : > { %v2033_v32 = vpop.eup %2032  ;;  %v1546_v51 = vmul.f32 %v2031_v11, %v1434_v53 }
 0x27c   : > { %v1545_v2 = vmul.f32 %v2033_v32, %v1433_v37 }
 0x27d   : > { %1563 = vst.msk [vmem:[%s2773_s17 + $0x78] sm:$0xff] %vm1547_vm12, %v1546_v51  ;;  %v1593_v4 = vsel %vm1547_vm12, %v1546_v51, 0.0 }
 0x27e   : > { %1562 = vst.msk [vmem:[%s2773_s17 + $0x70] sm:$0xff] %vm1547_vm12, %v1545_v2  ;;  %v1591_v63 = vsel %vm1547_vm12, %v1545_v2, 0.0 }
 0x27f   : > { %v1592_v33 = vadd.f32 %v1591_v63, %v1590_v21 }
 0x281   : > { %v1594_v5 = vadd.f32 %v1593_v4, %v1592_v33 }
 0x283   : > { %v1595_v6 = vrot.slane %v1594_v5, 4 }
 0x285   : > { %v1596_v0 = vadd.f32 %v1595_v6, %v1594_v5 }
 0x287   : > { %v1597_v15 = vrot.slane %v1596_v0, 2 }
 0x289   : > { %v1598_v24 = vadd.f32 %v1597_v15, %v1596_v0 }
 0x28b   : > { %v1599_v35 = vrot.slane %v1598_v24, 1 }
 0x28d   : > { %v1600_v50 = vadd.f32 %v1599_v35, %v1598_v24 }
 0x28f   : > { %1601 = vst.msk [vmem:[%s270_s11] sm:$0xff] %vm1547_vm12, %v1600_v50 }
 0x290 PF: > { %s16_s22 = sadd.s32 1, %s2072_s22   ;;  %s2879_s18 = smov %s2064_s20 }
 0x291   : > { %p13_p8 = scmp.ge.s32.totalorder %s16_s22, 6   ;;  %s2880_s19 = smov %s2068_s21 }
 0x292   : > { %s2881_s20 = smov %s2884_s23  ;;  %s2882_s21 = smov %s2888_s24 }
 0x293   :  { %15 = sbr.rel (!%p13_p8) target bundleno = 3 (0x3), region = 81 }

// kernel: bottleneck_odconv_forward.3
= control target key start
LH: loop header
LB: loop body
LE: loop exit
PB: predicated region body
PF: predicated region fallthrough
CT: control target
= control target key end

     0   :  { %s1815_s12 = smov 0   ;;  %s1817_s13 = smov 0   ;;  %s2677_s0 = inlined_call_operand.vmem [shape: f32[2,18,18,2], index: 0, kind: input, shape index: {}]   ;;  %s2678_s1 = inlined_call_operand.vmem [shape: f32[2,18,4], index: 1, kind: input, shape index: {}]   ;;  %s2679_s2 = inlined_call_operand.vmem [shape: f32[2,16,16,4], index: 2, kind: input, shape index: {}]   ;;  %s2680_s3 = inlined_call_operand.vmem [shape: f32[2,16,16,4], index: 3, kind: output, shape index: {}]  }
   0x1   :  { %s1819_s14 = smov 0   ;;  %s1821_s15 = smov 0  }
   0x2   :  { %s1823_s16 = smov 0  }
   0x3 LB: > { %s22_s17 = sadd.s32 1, %s1777_s14  ;;  %s25_s18 = sadd.s32 1, %s1781_s15  ;;  %s1785_s16 = sphi %s1823_s16, %s13_s16   ;;  %s1781_s15 = sphi %s1821_s15, %s2696_s15   ;;  %s1777_s14 = sphi %s1819_s14, %s2695_s14   ;;  %s1773_s13 = sphi %s1817_s13, %s2694_s13   ;;  %s1769_s12 = sphi %s1815_s12, %s2693_s12  }
   0x4   : > { %p23_p0 = scmp.ge.s32.totalorder %s22_s17, 2  ;;  %p1556_p1 = scmp.ge.s32.totalorder %s1785_s16, 1 }
   0x5   : > { %p179_p2 = scmp.lt.s32.totalorder %s1785_s16, 5 }
   0x6   : > { %s2698_s17 = smov (%p23_p0, %s22_s17), 0  ;;  %s2700_s18 = smov (!%p23_p0, %s25_s18), %s1781_s15 }
   0x7   : > { %p180_p3 = pnand %p1556_p1, %p179_p2  ;;  %p27_p4 = scmp.ge.s32.totalorder %s2700_s18, 2 }
   0x9   : > { %s2702_s18 = smov (%p27_p4, %s2700_s18), 0  ;;  %183 = sbr.rel (%p180_p3) target bundleno = 612 (0x264), region = 32 }
  0x10   : > { %p223_p5 = scmp.lt.s32.totalorder %s1773_s13, 1  ;;  %s1568_s19 = smul.u32 192, %s1769_s12  ;;  %vm306_vm0 = vcmask 1046528   ;;  %vm347_vm1 = vcmask 1045504   ;;  %vm1222_vm2 = vcmask 1041408   ;;  %vm1034_vm3 = vcmask 15360  }
  0x11   : > { %s1787_s25 = smov 2   ;;  %s1788_s26 = smov 4   ;;  %vm1051_vm4 = vcmask 31744   ;;  %vm1068_vm5 = vcmask 48128   ;;  %vm1085_vm6 = vcmask 64512   ;;  %vm1102_vm7 = vcmask 80896  }
  0x12   : > { %s2704_s13 = smov (!%p223_p5, %s1773_s13), 1  ;;  %s1789_s27 = smov 6   ;;  %vm1119_vm8 = vcmask 97280   ;;  %vm1136_vm9 = vcmask 113664   ;;  %vm1153_vm10 = vcmask 130048   ;;  %vm1173_vm11 = vcmask 146432  }
  0x13   : > { %s1697_s20 = smul.u32 432, %s2704_s13  ;;  %s1790_s28 = smov 8  }
  0x14   : > { %s1791_s29 = smov 10   ;;  %s1792_s30 = smov 12  }
  0x15   : > { %s227_s23 = scalar_lea.vmem %s2677_s0, %s1697_s20  ;;  %s1793_s4 = smov 14  }
  0x16   : > { %s1854_s24 = scalar_lea.vmem %s227_s23, %s1568_s19  ;;  %s1698_s5 = smul.u32 24, %s2704_s13 }
  0x17   : > { %v1857_v0 = vld [vmem:[%s1854_s24 + $0x8] sm:$0xff]  ;;  %v260_v1 = vld [vmem:[%s1854_s24 + $0x10] sm:$0x3]  ;;  %v1861_v2 = vld [vmem:[%s1854_s24] sm:$0xff]  ;;  %s1794_s9 = smov 16   ;;  %s1559_s10 = sshll.u32 %s1769_s12, 3 }
  0x18   : > { %v308_v3 = vrot.slane %v1857_v0, 1  ;;  %v310_v4 = vrot.slane %v260_v1, 1  ;;  %v307_v5 = vrot.slane %v1861_v2, 1  ;;  %v1866_v6 = vld [vmem:[%s1854_s24 + $0x68] sm:$0xff]  ;;  %v272_v7 = vld [vmem:[%s1854_s24 + $0x70] sm:$0x3]  ;;  %s232_s8 = scalar_lea.vmem %s2678_s1, %s1698_s5 }
  0x19   : > { %v1870_v8 = vrot.slane %v1866_v6, 1  ;;  %v330_v9 = vrot.slane %v272_v7, 1  ;;  %v1873_v10 = vld [vmem:[%s1854_s24 + $0x60] sm:$0xff]  ;;  %v1881_v14 = vrot.slane %v1866_v6, 2  ;;  %v348_v15 = vrot.slane %v1861_v2, 2  ;;  %v1909_v26 = vld [vmem:[%s1854_s24 + $0x78] sm:$0xff] }
  0x1a   : > { %v311_v11 = vsel %vm306_vm0, %v308_v3, %v310_v4  ;;  %v309_v12 = vsel %vm306_vm0, %v307_v5, %v308_v3  ;;  %v327_v13 = vrot.slane %v1873_v10, 1  ;;  %v368_v18 = vrot.slane %v1873_v10, 2  ;;  %v1912_v27 = vld [vmem:[%s1854_s24 + $0x18] sm:$0xff]  ;;  %v1915_v28 = vld [vmem:[%s1854_s24 + $0x80] sm:$0xff]  ;;  %v1585_v36 = vld [vmem:[%s1854_s24 + $0x88] sm:$0x3] }
  0x1b   : > { %652 = vrot.lane.b32.xlu1 %v311_v11, %s1787_s25  ;;  %650 = vrot.lane.b32.xlu0 %v309_v12, %s1787_s25  ;;  %v331_v16 = vsel %vm306_vm0, %v1870_v8, %v330_v9  ;;  %v349_v19 = vrot.slane %v1857_v0, 2  ;;  %v371_v22 = vrot.slane %v272_v7, 2  ;;  %v351_v23 = vrot.slane %v260_v1, 2  ;;  %v1918_v29 = vld [vmem:[%s1854_s24 + $0x20] sm:$0xff]  ;;  %v1573_v37 = vld [vmem:[%s1854_s24 + $0x28] sm:$0x3] }
  0x1c   : > { %v1888_v17 = vsel %vm306_vm0, %v327_v13, %v1870_v8  ;;  %v1897_v20 = vsel %vm347_vm1, %v368_v18, %v1881_v14  ;;  %v459_v30 = vrot.slane %v1909_v26, 1  ;;  %v439_v31 = vrot.slane %v1912_v27, 1  ;;  %v275_v46 = vld [vmem:[%s1854_s24 + $0x88] sm:$0x3]  ;;  %v1965_v58 = vld [vmem:[%s1854_s24 + $0x90] sm:$0xff]  ;;  %v1979_v1 = vld [vmem:[%s1854_s24 + $0x98] sm:$0xff] }
  0x1d   : > { %v350_v21 = vsel %vm347_vm1, %v348_v15, %v349_v19  ;;  %v372_v24 = vsel %vm347_vm1, %v1881_v14, %v371_v22  ;;  %v352_v25 = vsel %vm347_vm1, %v349_v19, %v351_v23  ;;  %v460_v32 = vrot.slane %v1915_v28, 1  ;;  %v263_v47 = vld [vmem:[%s1854_s24 + $0x28] sm:$0x3]  ;;  %v1968_v59 = vld [vmem:[%s1854_s24 + $0x30] sm:$0xff]  ;;  %v1982_v3 = vld [vmem:[%s1854_s24 + $0x38] sm:$0xff]  ;;  %p236_p6 = scmp.lt.s32.totalorder %s1559_s10, 15 }
  0x1e   : > { %v440_v33 = vrot.slane %v1918_v29, 1  ;;  %v462_v38 = vrot.slane %v1585_v36, 1  ;;  %v442_v39 = vrot.slane %v1573_v37, 1  ;;  %v499_v40 = vrot.slane %v1909_v26, 2  ;;  %v1611_v13 = vld [vmem:[%s1854_s24 + $0xa0] sm:$0x3] }
  0x1f   : > { %668 = vrot.lane.b32.xlu1 %v331_v16, %s1787_s25  ;;  %666 = vrot.lane.b32.xlu0 %v1888_v17, %s1787_s25  ;;  %v461_v34 = vsel %vm306_vm0, %v459_v30, %v460_v32  ;;  %v479_v41 = vrot.slane %v1912_v27, 2  ;;  %v500_v42 = vrot.slane %v1915_v28, 2  ;;  %v480_v43 = vrot.slane %v1918_v29, 2  ;;  %v1599_v15 = vld [vmem:[%s1854_s24 + $0x40] sm:$0x3]  ;;  %s2706_s10 = smov (!%p236_p6, %s1559_s10), 15 }
  0x20   : > { %v441_v35 = vsel %vm306_vm0, %v439_v31, %v440_v33  ;;  %v463_v44 = vsel %vm306_vm0, %v460_v32, %v462_v38  ;;  %v443_v45 = vsel %vm306_vm0, %v440_v33, %v442_v39  ;;  %v335_v50 = vrot.slane %v275_v46, 1  ;;  %v1170_v30 = vld [vmem:[%s232_s8] sm:$0xff]  ;;  %v1171_v31 = vld [vmem:[%s232_s8 + $0x8] sm:$0xff]  ;;  %v1172_v39 = vld [vmem:[%s232_s8 + $0x10] sm:$0x3]  ;;  %s1560_s11 = sshll.u32 %s2706_s10, 1 }
  0x21   : > { %v501_v48 = vsel %vm347_vm1, %v499_v40, %v500_v42  ;;  %v481_v49 = vsel %vm347_vm1, %v479_v41, %v480_v43  ;;  %v315_v51 = vrot.slane %v263_v47, 1  ;;  %v502_v54 = vrot.slane %v1585_v36, 2  ;;  %v1576_v36 = vld [vmem:[%s1854_s24 + $0x40] sm:$0x3]  ;;  %s1561_s19 = sshll.u32 %s2704_s13, 5 }
  0x22   : > { %v336_v52 = vsel %vm306_vm0, %v460_v32, %v335_v50  ;;  %v482_v55 = vrot.slane %v1573_v37, 2  ;;  %v376_v60 = vrot.slane %v275_v46, 2  ;;  %v356_v61 = vrot.slane %v263_v47, 2  ;;  %s240_s20 = sadd.s32 %s1561_s19, %s1560_s11 }
  0x23   : > { %714 = vrot.lane.b32.xlu1 %v1897_v20, %s1788_s26  ;;  %698 = vrot.lane.b32.xlu0 %v350_v21, %s1788_s26  ;;  %v316_v53 = vsel %vm306_vm0, %v440_v33, %v315_v51  ;;  %v503_v56 = vsel %vm347_vm1, %v500_v42, %v502_v54  ;;  %v590_v4 = vrot.slane %v1965_v58, 1  ;;  %v570_v5 = vrot.slane %v1968_v59, 1  ;;  %s1562_s21 = sshll.u32 %s240_s20, 3 }
  0x24   : > { %v483_v57 = vsel %vm347_vm1, %v480_v43, %v482_v55  ;;  %v377_v62 = vsel %vm347_vm1, %v500_v42, %v376_v60  ;;  %v357_v63 = vsel %vm347_vm1, %v480_v43, %v356_v61  ;;  %v1991_v7 = vrot.slane %v1979_v1, 1  ;;  %s2615_s13 = scalar_lea.vmem %s2680_s3, %s1562_s21 }
  0x25   : > { %v1994_v9 = vrot.slane %v1982_v3, 1  ;;  %v593_v16 = vrot.slane %v1611_v13, 1  ;;  %v573_v18 = vrot.slane %v1599_v15, 1  ;;  %v630_v19 = vrot.slane %v1965_v58, 2 }
  0x26   : > { %v592_v11 = vsel %vm306_vm0, %v590_v4, %v1991_v7  ;;  %v610_v21 = vrot.slane %v1968_v59, 2  ;;  %v2017_v22 = vrot.slane %v1979_v1, 2  ;;  %v2020_v23 = vrot.slane %v1982_v3, 2 }
  0x27   : > { %716 = vrot.lane.b32.xlu1 %v372_v24, %s1788_s26  ;;  %700 = vrot.lane.b32.xlu0 %v352_v25, %s1788_s26  ;;  %v572_v12 = vsel %vm306_vm0, %v570_v5, %v1994_v9  ;;  %v594_v24 = vsel %vm306_vm0, %v1991_v7, %v593_v16  ;;  %v574_v25 = vsel %vm306_vm0, %v1994_v9, %v573_v18  ;;  %v447_v38 = vrot.slane %v1576_v36, 1 }
  0x28   : > { %v632_v32 = vsel %vm347_vm1, %v630_v19, %v2017_v22  ;;  %v612_v33 = vsel %vm347_vm1, %v610_v21, %v2020_v23  ;;  %v633_v42 = vrot.slane %v1611_v13, 2  ;;  %v613_v43 = vrot.slane %v1599_v15, 2  ;;  %v2101_v13 = vld [vmem:[%s1854_s24 + $0xb0] sm:$0xff] }
  0x29   : > { %v448_v41 = vsel %vm306_vm0, %v1994_v9, %v447_v38  ;;  %2687 = vst [vmem:[#allocation4_spill] sm:$0xff] %v2101_v13  ;;  %v2104_v15 = vld [vmem:[%s1854_s24 + $0x50] sm:$0xff]  ;;  %v2113_v19 = vrot.slane %v2101_v13, 1 }
  0x2a   : > { %v634_v46 = vsel %vm347_vm1, %v2017_v22, %v633_v42  ;;  %v614_v47 = vsel %vm347_vm1, %v2020_v23, %v613_v43  ;;  %2688 = vst [vmem:[#allocation5_spill] sm:$0xff] %v2104_v15  ;;  %v2116_v21 = vrot.slane %v2104_v15, 1  ;;  %v2155_v42 = vrot.slane %v2101_v13, 2 }
  0x2b   : > { %762 = vrot.lane.b32.xlu1 %v1909_v26, %s1789_s27  ;;  %746 = vrot.lane.b32.xlu0 %v1912_v27, %s1789_s27  ;;  %v2158_v43 = vrot.slane %v2104_v15, 2 }
  0x2f   : > { %764 = vrot.lane.b32.xlu1 %v1915_v28, %s1789_s27  ;;  %748 = vrot.lane.b32.xlu0 %v1918_v29, %s1789_s27 }
  0x33   : > { %810 = vrot.lane.b32.xlu1 %v461_v34, %s1790_s28  ;;  %794 = vrot.lane.b32.xlu0 %v441_v35, %s1790_s28 }
  0x37   : > { %670 = vrot.lane.b32.xlu1 %v461_v34, %s1787_s25  ;;  %654 = vrot.lane.b32.xlu0 %v441_v35, %s1787_s25  ;;  %v1689_v34 = vpack.c.bf16 %v1171_v31, %v1170_v30  ;;  %v1588_v35 = vld [vmem:[%s1854_s24 + $0xa0] sm:$0x3] }
  0x38   : > { %v467_v37 = vrot.slane %v1588_v35, 1 }
  0x39   : > { %1690 = vmatprep.subr.bf16.mxu0 %v1689_v34  ;;  %1693 = vmatprep.subr.bf16.mxu1 %v1689_v34 }
  0x3a   : > { %1692 = vmatpush3.bf16.msra.mxu0 %v1689_v34  ;;  %1695 = vmatpush3.bf16.msra.mxu1 %v1689_v34  ;;  %v468_v40 = vsel %vm306_vm0, %v1991_v7, %v467_v37  ;;  %v1614_v34 = vld [vmem:[%s1854_s24 + $0xb8] sm:$0x3] }
  0x3b   : > { %812 = vrot.lane.b32.xlu1 %v463_v44, %s1790_s28  ;;  %796 = vrot.lane.b32.xlu0 %v443_v45, %s1790_s28  ;;  %v278_v44 = vld [vmem:[%s1854_s24 + $0xa0] sm:$0x3] }
  0x3c   : > { %1663 = vmatprep.subr.msk.mxu0 %vm1222_vm2, %v1172_v39  ;;  %1694 = vmatprep.subr.msk.mxu1 %vm1222_vm2, %v1172_v39  ;;  %v266_v45 = vld [vmem:[%s1854_s24 + $0x40] sm:$0x3]  ;;  %v381_v60 = vrot.slane %v278_v44, 2 }
  0x3d   : > { %v361_v61 = vrot.slane %v266_v45, 2 }
  0x3e   : > { %1664 = vmatpush3.msk.msra.mxu0 %vm1222_vm2, %v1172_v39  ;;  %1696 = vmatpush3.msk.msra.mxu1 %vm1222_vm2, %v1172_v39  ;;  %v382_v4 = vsel %vm347_vm1, %v2017_v22, %v381_v60 }
  0x3f   : > { %858 = vrot.lane.b32.xlu1 %v501_v48, %s1791_s29  ;;  %842 = vrot.lane.b32.xlu0 %v481_v49, %s1791_s29  ;;  %v362_v5 = vsel %vm347_vm1, %v2020_v23, %v361_v61 }
  0x43   : > { %672 = vrot.lane.b32.xlu1 %v336_v52, %s1787_s25  ;;  %656 = vrot.lane.b32.xlu0 %v316_v53, %s1787_s25  ;;  %v507_v52 = vrot.slane %v1588_v35, 2  ;;  %v487_v53 = vrot.slane %v1576_v36, 2  ;;  %v1602_v35 = vld [vmem:[%s1854_s24 + $0x58] sm:$0x3]  ;;  %v598_v36 = vrot.slane %v1614_v34, 1 }
  0x44   : > { %v578_v37 = vrot.slane %v1602_v35, 1 }
  0x45   : > { %v508_v54 = vsel %vm347_vm1, %v2017_v22, %v507_v52  ;;  %v488_v55 = vsel %vm347_vm1, %v2020_v23, %v487_v53  ;;  %v1591_v52 = vld [vmem:[%s1854_s24 + $0xb8] sm:$0x3] }
  0x46   : > { %v1579_v53 = vld [vmem:[%s1854_s24 + $0x58] sm:$0x3] }
  0x47   : > { %718 = vrot.lane.b32.xlu1 %v501_v48, %s1788_s26  ;;  %702 = vrot.lane.b32.xlu0 %v481_v49, %s1788_s26  ;;  %v340_v48 = vrot.slane %v278_v44, 1  ;;  %v320_v49 = vrot.slane %v266_v45, 1  ;;  %v599_v44 = vsel %vm306_vm0, %v2113_v19, %v598_v36  ;;  %v579_v45 = vsel %vm306_vm0, %v2116_v21, %v578_v37 }
  0x48   : > { %v638_v36 = vrot.slane %v1614_v34, 2  ;;  %v618_v37 = vrot.slane %v1602_v35, 2 }
  0x49   : > { %v341_v50 = vsel %vm306_vm0, %v1991_v7, %v340_v48  ;;  %v321_v51 = vsel %vm306_vm0, %v1994_v9, %v320_v49 }
  0x4b   : > { %860 = vrot.lane.b32.xlu1 %v503_v56, %s1791_s29  ;;  %844 = vrot.lane.b32.xlu0 %v483_v57, %s1791_s29  ;;  %v2073_v56 = vld [vmem:[%s1854_s24 + $0xa8] sm:$0xff] }
  0x4c   : > { %2685 = vst [vmem:[#allocation2_spill] sm:$0xff] %v2073_v56  ;;  %v2076_v57 = vld [vmem:[%s1854_s24 + $0x48] sm:$0xff]  ;;  %v595_v16 = vrot.slane %v2073_v56, 1 }
  0x4d   : > { %2686 = vst [vmem:[#allocation3_spill] sm:$0xff] %v2076_v57  ;;  %v575_v18 = vrot.slane %v2076_v57, 1 }
  0x4f   : > { %906 = vrot.lane.b32.xlu1 %v1965_v58, %s1792_s30  ;;  %890 = vrot.lane.b32.xlu0 %v1968_v59, %s1792_s30 }
  0x53   : > { %720 = vrot.lane.b32.xlu1 %v377_v62, %s1788_s26  ;;  %704 = vrot.lane.b32.xlu0 %v357_v63, %s1788_s26 }
  0x57   : > { %766 = vrot.lane.b32.xlu1 %v1965_v58, %s1789_s27  ;;  %750 = vrot.lane.b32.xlu0 %v1968_v59, %s1789_s27 }
  0x5b   : > { %908 = vrot.lane.b32.xlu1 %v1979_v1, %s1792_s30  ;;  %892 = vrot.lane.b32.xlu0 %v1982_v3, %s1792_s30 }
  0x5f   : > { %954 = vrot.lane.b32.xlu1 %v592_v11, %s1793_s4  ;;  %938 = vrot.lane.b32.xlu0 %v572_v12, %s1793_s4 }
  0x63   : > { %768 = vrot.lane.b32.xlu1 %v1979_v1, %s1789_s27  ;;  %752 = vrot.lane.b32.xlu0 %v1982_v3, %s1789_s27 }
  0x67   : > { %814 = vrot.lane.b32.xlu1 %v592_v11, %s1790_s28  ;;  %798 = vrot.lane.b32.xlu0 %v572_v12, %s1790_s28 }
  0x6b   : > { %956 = vrot.lane.b32.xlu1 %v594_v24, %s1793_s4  ;;  %940 = vrot.lane.b32.xlu0 %v574_v25, %s1793_s4  ;;  %v597_v24 = vsel %vm306_vm0, %v595_v16, %v2113_v19  ;;  %v577_v25 = vsel %vm306_vm0, %v575_v18, %v2116_v21 }
  0x6f   : > { %1002 = vrot.lane.b32.xlu1 %v632_v32, %s1794_s9  ;;  %986 = vrot.lane.b32.xlu0 %v612_v33, %s1794_s9 }
  0x73   : > { %674 = vrot.lane.b32.xlu1 %v592_v11, %s1787_s25  ;;  %658 = vrot.lane.b32.xlu0 %v572_v12, %s1787_s25 }
  0x77   : > { %816 = vrot.lane.b32.xlu1 %v468_v40, %s1790_s28  ;;  %800 = vrot.lane.b32.xlu0 %v448_v41, %s1790_s28  ;;  %v635_v40 = vrot.slane %v2073_v56, 2  ;;  %v615_v41 = vrot.slane %v2076_v57, 2 }
  0x79   : > { %v637_v48 = vsel %vm347_vm1, %v635_v40, %v2155_v42  ;;  %v617_v49 = vsel %vm347_vm1, %v615_v41, %v2158_v43  ;;  %v281_v41 = vld [vmem:[%s1854_s24 + $0xb8] sm:$0x3] }
  0x7b   : > { %862 = vrot.lane.b32.xlu1 %v632_v32, %s1791_s29  ;;  %846 = vrot.lane.b32.xlu0 %v612_v33, %s1791_s29 }
  0x7f   : > { %1004 = vrot.lane.b32.xlu1 %v634_v46, %s1794_s9  ;;  %988 = vrot.lane.b32.xlu0 %v614_v47, %s1794_s9 }
  0x83   : > { %676 = vrot.lane.b32.xlu1 %v341_v50, %s1787_s25  ;;  %660 = vrot.lane.b32.xlu0 %v321_v51, %s1787_s25 }
  0x87   : > { %722 = vrot.lane.b32.xlu1 %v632_v32, %s1788_s26  ;;  %706 = vrot.lane.b32.xlu0 %v612_v33, %s1788_s26 }
  0x8b   : > { %864 = vrot.lane.b32.xlu1 %v508_v54, %s1791_s29  ;;  %848 = vrot.lane.b32.xlu0 %v488_v55, %s1791_s29  ;;  %v472_v54 = vrot.slane %v1591_v52, 1  ;;  %v452_v55 = vrot.slane %v1579_v53, 1 }
  0x8d   : > { %v2078_v62 = vpop.permute.xlu1 %652  ;;  %v2080_v63 = vpop.permute.xlu0 %650 }
  0x8f   : > { %910 = vrot.lane.b32.xlu1 %v2073_v56, %s1792_s30  ;;  %894 = vrot.lane.b32.xlu0 %v2076_v57, %s1792_s30 }
  0x91   : > { %v2090_v7 = vpop.permute.xlu1 %668  ;;  %v2092_v9 = vpop.permute.xlu0 %666 }
  0x93   : > { %724 = vrot.lane.b32.xlu1 %v382_v4, %s1788_s26  ;;  %708 = vrot.lane.b32.xlu0 %v362_v5, %s1788_s26  ;;  %v473_v4 = vsel %vm306_vm0, %v2113_v19, %v472_v54  ;;  %v453_v5 = vsel %vm306_vm0, %v2116_v21, %v452_v55  ;;  %v345_v54 = vrot.slane %v281_v41, 1 }
  0x95   : > { %v2096_v11 = vpop.permute.xlu1 %714  ;;  %v2098_v12 = vpop.permute.xlu0 %698  ;;  %v346_v35 = vsel %vm306_vm0, %v2113_v19, %v345_v54 }
  0x97   : > { %770 = vrot.lane.b32.xlu1 %v2073_v56, %s1789_s27  ;;  %754 = vrot.lane.b32.xlu0 %v2076_v57, %s1789_s27 }
  0x99   : > { %v2118_v22 = vpop.permute.xlu1 %716  ;;  %v2120_v23 = vpop.permute.xlu0 %700 }
  0x9b   : > { %912 = vrot.lane.b32.xlu1 %v2101_v13, %s1792_s30  ;;  %896 = vrot.lane.b32.xlu0 %v2104_v15, %s1792_s30 }
  0x9d   : > { %v2130_v30 = vpop.permute.xlu1 %762  ;;  %v2132_v31 = vpop.permute.xlu0 %746 }
  0x9f   : > { %958 = vrot.lane.b32.xlu1 %v597_v24, %s1793_s4  ;;  %942 = vrot.lane.b32.xlu0 %v577_v25, %s1793_s4 }
  0xa1   : > { %v2136_v32 = vpop.permute.xlu1 %764  ;;  %v2138_v33 = vpop.permute.xlu0 %748 }
  0xa3   : > { %772 = vrot.lane.b32.xlu1 %v2101_v13, %s1789_s27  ;;  %756 = vrot.lane.b32.xlu0 %v2104_v15, %s1789_s27  ;;  %v512_v15 = vrot.slane %v1591_v52, 2  ;;  %v492_v13 = vrot.slane %v1579_v53, 2  ;;  %v2235_v52 = vld [vmem:[%s1854_s24 + $0xc0] sm:$0xff]  ;;  %v386_v53 = vrot.slane %v281_v41, 2 }
  0xa5   : > { %v2146_v38 = vpop.permute.xlu1 %810  ;;  %v2148_v39 = vpop.permute.xlu0 %794  ;;  %v513_v19 = vsel %vm347_vm1, %v2155_v42, %v512_v15 }
  0xa7   : > { %818 = vrot.lane.b32.xlu1 %v597_v24, %s1790_s28  ;;  %802 = vrot.lane.b32.xlu0 %v577_v25, %s1790_s28 }
  0xa9   : > { %v2164_v46 = vpop.permute.xlu1 %670  ;;  %v2166_v47 = vpop.permute.xlu0 %654 }
  0xab   : > { %960 = vrot.lane.b32.xlu1 %v599_v44, %s1793_s4  ;;  %944 = vrot.lane.b32.xlu0 %v579_v45, %s1793_s4  ;;  %v639_v44 = vsel %vm347_vm1, %v2155_v42, %v638_v36  ;;  %v619_v45 = vsel %vm347_vm1, %v2158_v43, %v618_v37 }
  0xad   : > { %v2174_v50 = vpop.permute.xlu1 %812  ;;  %v2176_v51 = vpop.permute.xlu0 %796 }
  0xaf   : > { %1006 = vrot.lane.b32.xlu1 %v637_v48, %s1794_s9  ;;  %990 = vrot.lane.b32.xlu0 %v617_v49, %s1794_s9 }
  0xb1   : > { %v2182_v60 = vpop.permute.xlu1 %858  ;;  %v2184_v61 = vpop.permute.xlu0 %842 }
  0xb3   : > { %678 = vrot.lane.b32.xlu1 %v597_v24, %s1787_s25  ;;  %662 = vrot.lane.b32.xlu0 %v577_v25, %s1787_s25  ;;  %v269_v25 = vld [vmem:[%s1854_s24 + $0x58] sm:$0x3] }
  0xb4   : > { %v325_v55 = vrot.slane %v269_v25, 1 }
  0xb5   : > { %v2192_v16 = vpop.permute.xlu1 %672  ;;  %v2194_v18 = vpop.permute.xlu0 %656 }
  0xb7   : > { %820 = vrot.lane.b32.xlu1 %v473_v4, %s1790_s28  ;;  %804 = vrot.lane.b32.xlu0 %v453_v5, %s1790_s28  ;;  %v326_v5 = vsel %vm306_vm0, %v2116_v21, %v325_v55  ;;  %v493_v21 = vsel %vm347_vm1, %v2158_v43, %v492_v13  ;;  %v387_v13 = vsel %vm347_vm1, %v2155_v42, %v386_v53 }
  0xb8   : > { %v1045_v42 = vsel %vm1034_vm3, %v1909_v26, %v2164_v46 }
  0xb9   : > { %v719_v40 = vpop.permute.xlu1 %718  ;;  %v703_v24 = vpop.permute.xlu0 %702 }
  0xba   : > { %v1062_v53 = vsel %vm1051_vm4, %v1045_v42, %v719_v40  ;;  %v1035_v40 = vsel %vm1034_vm3, %v1861_v2, %v2080_v63 }
  0xbb   : > { %866 = vrot.lane.b32.xlu1 %v637_v48, %s1791_s29  ;;  %850 = vrot.lane.b32.xlu0 %v617_v49, %s1791_s29 }
  0xbd   : > { %v2206_v4 = vpop.permute.xlu1 %860  ;;  %v2208_v34 = vpop.permute.xlu0 %844 }
  0xbf   : > { %1008 = vrot.lane.b32.xlu1 %v639_v44, %s1794_s9  ;;  %992 = vrot.lane.b32.xlu0 %v619_v45, %s1794_s9 }
  0xc1   : > { %v2216_v36 = vpop.permute.xlu1 %906  ;;  %v2218_v37 = vpop.permute.xlu0 %890 }
  0xc3   : > { %680 = vrot.lane.b32.xlu1 %v346_v35, %s1787_s25  ;;  %664 = vrot.lane.b32.xlu0 %v326_v5, %s1787_s25  ;;  %v366_v35 = vrot.slane %v269_v25, 2 }
  0xc5   : > { %v2222_v44 = vpop.permute.xlu1 %720  ;;  %v2224_v45 = vpop.permute.xlu0 %704  ;;  %v367_v15 = vsel %vm347_vm1, %v2158_v43, %v366_v35  ;;  %v1037_v43 = vsel %vm1034_vm3, %v1912_v27, %v2166_v47 }
  0xc6   : > { %v1054_v35 = vsel %vm1051_vm4, %v1037_v43, %v703_v24  ;;  %v1043_v24 = vsel %vm1034_vm3, %v1873_v10, %v2092_v9 }
  0xc7   : > { %726 = vrot.lane.b32.xlu1 %v637_v48, %s1788_s26  ;;  %710 = vrot.lane.b32.xlu0 %v617_v49, %s1788_s26 }
  0xc9   : > { %v767_v54 = vpop.permute.xlu1 %766  ;;  %v751_v55 = vpop.permute.xlu0 %750 }
  0xca   : > { %v1079_v26 = vsel %vm1068_vm5, %v1062_v53, %v767_v54  ;;  %v1071_v27 = vsel %vm1068_vm5, %v1054_v35, %v751_v55  ;;  %v1060_v54 = vsel %vm1051_vm4, %v1043_v24, %v2096_v11  ;;  %v1052_v55 = vsel %vm1051_vm4, %v1035_v40, %v2098_v12 }
  0xcb   : > { %868 = vrot.lane.b32.xlu1 %v513_v19, %s1791_s29  ;;  %852 = vrot.lane.b32.xlu0 %v493_v21, %s1791_s29  ;;  %v2256_v21 = vld [vmem:[%s1854_s24 + $0xc8] sm:$0xff]  ;;  %v1077_v63 = vsel %vm1068_vm5, %v1060_v54, %v2130_v30  ;;  %v640_v40 = vrot.slane %v2235_v52, 2 }
  0xcc   : > { %v1094_v11 = vsel %vm1085_vm6, %v1077_v63, %v2146_v38 }
  0xcd   : > { %v2237_v48 = vpop.permute.xlu1 %908  ;;  %v2239_v49 = vpop.permute.xlu0 %892  ;;  %v1111_v30 = vsel %vm1102_vm7, %v1094_v11, %v2182_v60 }
  0xce   : > { %v1128_v38 = vsel %vm1119_vm8, %v1111_v30, %v2216_v36 }
  0xcf   : > { %914 = vrot.lane.b32.xlu1 %v2235_v52, %s1792_s30  ;;  %898 = vrot.lane.b32.xlu0 %v1873_v10, %s1792_s30 }
  0xd1   : > { %v955_v5 = vpop.permute.xlu1 %954  ;;  %v939_v19 = vpop.permute.xlu0 %938 }
  0xd2   : > { %v1145_v43 = vsel %vm1136_vm9, %v1128_v38, %v955_v5 }
  0xd3   : > { %728 = vrot.lane.b32.xlu1 %v387_v13, %s1788_s26  ;;  %712 = vrot.lane.b32.xlu0 %v367_v15, %s1788_s26  ;;  %v600_v13 = vrot.slane %v2235_v52, 1  ;;  %v2272_v15 = vrot.slane %v2256_v21, 1 }
  0xd5   : > { %v2251_v41 = vpop.permute.xlu1 %768  ;;  %v2253_v25 = vpop.permute.xlu0 %752  ;;  %v602_v2 = vsel %vm306_vm0, %v600_v13, %v2272_v15 }
  0xd7   : > { %774 = vrot.lane.b32.xlu1 %v2235_v52, %s1789_s27  ;;  %758 = vrot.lane.b32.xlu0 %v1873_v10, %s1789_s27  ;;  %v1069_v10 = vsel %vm1068_vm5, %v1052_v55, %v2132_v31  ;;  %v2356_v55 = vrot.slane %v2256_v21, 2  ;;  %v1594_v52 = vld [vmem:[%s1854_s24 + $0xd0] sm:$0x3] }
  0xd8   : > { %v1086_v12 = vsel %vm1085_vm6, %v1069_v10, %v2148_v39 }
  0xd9   : > { %v815_v46 = vpop.permute.xlu1 %814  ;;  %v799_v47 = vpop.permute.xlu0 %798  ;;  %v1103_v31 = vsel %vm1102_vm7, %v1086_v12, %v2184_v61  ;;  %v2324_v61 = vld [vmem:[%s1854_s24 + $0xd0] sm:$0x3]  ;;  %v642_v11 = vsel %vm347_vm1, %v640_v40, %v2356_v55  ;;  %v477_v12 = vrot.slane %v1594_v52, 1 }
  0xda   : > { %v2277_v57 = vsel %vm1085_vm6, %v1079_v26, %v815_v46  ;;  %v2280_v56 = vsel %vm1085_vm6, %v1071_v27, %v799_v47  ;;  %v1120_v39 = vsel %vm1119_vm8, %v1103_v31, %v2218_v37  ;;  %v2329_v27 = vld [vmem:[%s1854_s24 + $0x70] sm:$0x3]  ;;  %v603_v36 = vrot.slane %v2324_v61, 1 }
  0xdb   : > { %916 = vrot.lane.b32.xlu1 %v2256_v21, %s1792_s30  ;;  %900 = vrot.lane.b32.xlu0 %v1866_v6, %s1792_s30  ;;  %v1137_v60 = vsel %vm1136_vm9, %v1120_v39, %v939_v19  ;;  %v583_v19 = vrot.slane %v2329_v27, 1  ;;  %v1046_v46 = vsel %vm1034_vm3, %v1915_v28, %v2192_v16  ;;  %v1038_v47 = vsel %vm1034_vm3, %v1918_v29, %v2194_v18 }
  0xdc   : > { %v1063_v24 = vsel %vm1051_vm4, %v1046_v46, %v2222_v44  ;;  %v1055_v54 = vsel %vm1051_vm4, %v1038_v47, %v2224_v45  ;;  %v604_v28 = vsel %vm306_vm0, %v2272_v15, %v603_v36  ;;  %v1618_v46 = vld [vmem:[%s1854_s24 + $0xd8] sm:$0xff] }
  0xdd   : > { %v2302_v9 = vpop.permute.xlu1 %956  ;;  %v2304_v42 = vpop.permute.xlu0 %940  ;;  %v1080_v29 = vsel %vm1068_vm5, %v1063_v24, %v2251_v41  ;;  %v1072_v16 = vsel %vm1068_vm5, %v1055_v54, %v2253_v25  ;;  %v584_v45 = vsel %vm306_vm0, %v1870_v8, %v583_v19  ;;  %v1036_v41 = vsel %vm1034_vm3, %v1857_v0, %v2078_v62  ;;  %v1606_v24 = vld [vmem:[%s1854_s24 + $0x78] sm:$0xff]  ;;  %v1619_v54 = vld [vmem:[%s1854_s24 + $0xe0] sm:$0xff] }
  0xde   : > { %v1044_v25 = vsel %vm1034_vm3, %v1866_v6, %v2090_v7  ;;  %v1053_v10 = vsel %vm1051_vm4, %v1036_v41, %v2120_v23 }
  0xdf   : > { %962 = vrot.lane.b32.xlu1 %v602_v2, %s1793_s4  ;;  %946 = vrot.lane.b32.xlu0 %v1888_v17, %s1793_s4  ;;  %v1061_v63 = vsel %vm1051_vm4, %v1044_v25, %v2118_v22 }
  0xe0   : > { %v1078_v0 = vsel %vm1068_vm5, %v1061_v63, %v2136_v32  ;;  %v1608_v63 = vld [vmem:[%s1854_s24 + $0x88] sm:$0x3] }
  0xe1   : > { %v1003_v53 = vpop.permute.xlu1 %1002  ;;  %v987_v35 = vpop.permute.xlu0 %986  ;;  %v1095_v23 = vsel %vm1085_vm6, %v1078_v0, %v2174_v50  ;;  %v478_v50 = vsel %vm306_vm0, %v2272_v15, %v477_v12  ;;  %v643_v15 = vrot.slane %v2324_v61, 2  ;;  %v588_v0 = vrot.slane %v1608_v63, 1 }
  0xe2   : > { %v1162_v13 = vsel %vm1153_vm10, %v1145_v43, %v1003_v53  ;;  %v1154_v26 = vsel %vm1153_vm10, %v1137_v60, %v987_v35  ;;  %v1112_v31 = vsel %vm1102_vm7, %v1095_v23, %v2206_v4  ;;  %v623_v60 = vrot.slane %v2329_v27, 2 }
  0xe3   : > { %776 = vrot.lane.b32.xlu1 %v2256_v21, %s1789_s27  ;;  %1677 = vmatprep.mubr.msk.f32.mxu1 %vm1173_vm11, %v1162_v13  ;;  %v517_v53 = vrot.slane %v1594_v52, 2  ;;  %v645_v23 = vrot.slane %v1618_v46, 2 }
  0xe4   : > { %760 = vrot.lane.b32.xlu0 %v1866_v6, %s1789_s27  ;;  %1665 = vmatprep.mubr.msk.f32.mxu0 %vm1173_vm11, %v1154_v26  ;;  %v1070_v6 = vsel %vm1068_vm5, %v1053_v10, %v2138_v33  ;;  %v1129_v33 = vsel %vm1119_vm8, %v1112_v31, %v2237_v48  ;;  %v624_v27 = vsel %vm347_vm1, %v1881_v14, %v623_v60 }
  0xe5   : > { %v2338_v37 = vpop.permute.xlu1 %674  ;;  %v2340_v5 = vpop.permute.xlu0 %658  ;;  %v1087_v30 = vsel %vm1085_vm6, %v1070_v6, %v2176_v51  ;;  %v1146_v51 = vsel %vm1136_vm9, %v1129_v33, %v2302_v9 }
  0xe6   : > { %v1104_v32 = vsel %vm1102_vm7, %v1087_v30, %v2208_v34  ;;  %v1047_v35 = vsel %vm1034_vm3, %v1965_v58, %v2338_v37  ;;  %v1039_v61 = vsel %vm1034_vm3, %v1968_v59, %v2340_v5  ;;  %v518_v58 = vsel %vm347_vm1, %v2356_v55, %v517_v53 }
  0xe7   : > { %822 = vrot.lane.b32.xlu1 %v602_v2, %s1790_s28  ;;  %v1582_v2 = vld [vmem:[%s1854_s24 + $0x70] sm:$0x3]  ;;  %v1121_v38 = vsel %vm1119_vm8, %v1104_v32, %v2239_v49  ;;  %v646_v30 = vrot.slane %v1619_v54, 2  ;;  %v625_v32 = vrot.slane %v1606_v24, 2 }
  0xe8   : > { %806 = vrot.lane.b32.xlu0 %v1888_v17, %s1790_s28  ;;  %v457_v22 = vrot.slane %v1582_v2, 1  ;;  %v1138_v4 = vsel %vm1136_vm9, %v1121_v38, %v2304_v42 }
  0xe9   : > { %v817_v18 = vpop.permute.xlu1 %816  ;;  %v801_v44 = vpop.permute.xlu0 %800 }
  0xea   : > { %v2370_v21 = vsel %vm1085_vm6, %v1080_v29, %v817_v18  ;;  %v2373_v17 = vsel %vm1085_vm6, %v1072_v16, %v801_v44  ;;  %v458_v48 = vsel %vm306_vm0, %v1870_v8, %v457_v22  ;;  %v644_v8 = vsel %vm347_vm1, %v2356_v55, %v643_v15  ;;  %v1607_v55 = vld [vmem:[%s1854_s24 + $0x80] sm:$0xff] }
  0xeb   : > { %964 = vrot.lane.b32.xlu1 %v604_v28, %s1793_s4  ;;  %v605_v28 = vrot.slane %v1618_v46, 1  ;;  %v585_v18 = vrot.slane %v1606_v24, 1  ;;  %v586_v52 = vrot.slane %v1607_v55, 1  ;;  %v626_v33 = vrot.slane %v1607_v55, 2 }
  0xec   : > { %948 = vrot.lane.b32.xlu0 %v584_v45, %s1793_s4 }
  0xed   : > { %v2394_v62 = vpop.permute.xlu1 %862  ;;  %v2396_v7 = vpop.permute.xlu0 %846 }
  0xef   : > { %1010 = vrot.lane.b32.xlu1 %v642_v11, %s1794_s9 }
  0xf0   : > { %994 = vrot.lane.b32.xlu0 %v1897_v20, %s1794_s9 }
  0xf1   : > { %v1005_v34 = vpop.permute.xlu1 %1004  ;;  %v989_v39 = vpop.permute.xlu0 %988 }
  0xf2   : > { %v1163_v43 = vsel %vm1153_vm10, %v1146_v51, %v1005_v34  ;;  %v1155_v49 = vsel %vm1153_vm10, %v1138_v4, %v989_v39  ;;  %v589_v51 = vsel %vm306_vm0, %v586_v52, %v588_v0  ;;  %v647_v4 = vsel %vm347_vm1, %v645_v23, %v646_v30 }
  0xf3   : > { %824 = vrot.lane.b32.xlu1 %v478_v50, %s1790_s28  ;;  %1678 = vmatmul.mubr.msk.f32.vlgmr.msra.gmra.mrb[0].mxu1 %vm1173_vm11, %v1163_v43  ;;  %v627_v43 = vsel %vm347_vm1, %v625_v32, %v626_v33 }
  0xf4   : > { %808 = vrot.lane.b32.xlu0 %v458_v48, %s1790_s28  ;;  %1666 = vmatmul.mubr.msk.f32.vlgmr.msra.gmra.mrb[0].mxu0 %vm1173_vm11, %v1155_v49  ;;  %v628_v49 = vrot.slane %v1608_v63, 2 }
  0xf5   : > { %v677_v9 = vpop.permute.xlu1 %676  ;;  %v661_v42 = vpop.permute.xlu0 %660 }
  0xf6   : > { %v1048_v29 = vsel %vm1034_vm3, %v1979_v1, %v677_v9  ;;  %v1040_v16 = vsel %vm1034_vm3, %v1982_v3, %v661_v42  ;;  %v587_v3 = vsel %vm306_vm0, %v585_v18, %v586_v52  ;;  %v629_v60 = vsel %vm347_vm1, %v626_v33, %v628_v49 }
  0xf7   : > { %870 = vrot.lane.b32.xlu1 %v642_v11, %s1791_s29 }
  0xf8   : > { %854 = vrot.lane.b32.xlu0 %v1897_v20, %s1791_s29  ;;  %v497_v20 = vrot.slane %v1582_v2, 2  ;;  %v1620_v2 = vld [vmem:[%s1854_s24 + $0xe8] sm:$0x3]  ;;  %s2607_s24 = scalar_lea.vmem %s2679_s2, %s1562_s21 }
  0xf9   : > { %v723_v13 = vpop.permute.xlu1 %722  ;;  %v707_v26 = vpop.permute.xlu0 %706  ;;  %v608_v1 = vrot.slane %v1620_v2, 1  ;;  %v648_v34 = vrot.slane %v1620_v2, 2 }
  0xfa   : > { %v1064_v36 = vsel %vm1051_vm4, %v1047_v35, %v723_v13  ;;  %v1056_v19 = vsel %vm1051_vm4, %v1039_v61, %v707_v26  ;;  %v498_v5 = vsel %vm347_vm1, %v1881_v14, %v497_v20  ;;  %v606_v14 = vrot.slane %v1619_v54, 1 }
  0xfb   : > { %1012 = vrot.lane.b32.xlu1 %v644_v8, %s1794_s9  ;;  %v649_v15 = vsel %vm347_vm1, %v646_v30, %v648_v34 }
  0xfc   : > { %996 = vrot.lane.b32.xlu0 %v624_v27, %s1794_s9  ;;  %v607_v10 = vsel %vm306_vm0, %v605_v28, %v606_v14  ;;  %v609_v31 = vsel %vm306_vm0, %v606_v14, %v608_v1 }
  0xfd   : > { %v2448_v59 = vpop.permute.xlu1 %864  ;;  %v2450_v37 = vpop.permute.xlu0 %848 }
  0xfe   : > { %v1114_v18 = vsel %vm1102_vm7, %v2370_v21, %v2448_v59  ;;  %v2689_v59 = vld [vmem:[#allocation2_spill] sm:$0xff] }
  0xff   : > { %872 = vrot.lane.b32.xlu1 %v518_v58, %s1791_s29 }
 0x100   : > { %856 = vrot.lane.b32.xlu0 %v498_v5, %s1791_s29 }
 0x101   : > { %v2457_v47 = vpop.permute.xlu1 %910  ;;  %v2459_v40 = vpop.permute.xlu0 %894 }
 0x103   : > { %918 = vrot.lane.b32.xlu1 %v1618_v46, %s1792_s30 }
 0x104   : > { %902 = vrot.lane.b32.xlu0 %v1606_v24, %s1792_s30 }
 0x105   : > { %v725_v44 = vpop.permute.xlu1 %724  ;;  %v709_v45 = vpop.permute.xlu0 %708 }
 0x106   : > { %v1065_v41 = vsel %vm1051_vm4, %v1048_v29, %v725_v44  ;;  %v1057_v25 = vsel %vm1051_vm4, %v1040_v16, %v709_v45  ;;  %v1106_v44 = vsel %vm1102_vm7, %v2373_v17, %v2450_v37 }
 0x107   : > { %920 = vrot.lane.b32.xlu1 %v1619_v54, %s1792_s30 }
 0x108   : > { %904 = vrot.lane.b32.xlu0 %v1607_v55, %s1792_s30 }
 0x109   : > { %v771_v11 = vpop.permute.xlu1 %770  ;;  %v755_v12 = vpop.permute.xlu0 %754 }
 0x10a   : > { %v1081_v6 = vsel %vm1068_vm5, %v1064_v36, %v771_v11  ;;  %v1073_v22 = vsel %vm1068_vm5, %v1056_v19, %v755_v12  ;;  %v1113_v36 = vsel %vm1102_vm7, %v2277_v57, %v2394_v62  ;;  %v1105_v19 = vsel %vm1102_vm7, %v2280_v56, %v2396_v7  ;;  %v2690_v11 = vld [vmem:[#allocation3_spill] sm:$0xff] }
 0x10b   : > { %966 = vrot.lane.b32.xlu1 %v607_v10, %s1793_s4  ;;  %v1130_v58 = vsel %vm1119_vm8, %v1113_v36, %v2457_v47  ;;  %v1122_v5 = vsel %vm1119_vm8, %v1105_v19, %v2459_v40 }
 0x10c   : > { %950 = vrot.lane.b32.xlu0 %v587_v3, %s1793_s4 }
 0x10d   : > { %v913_v38 = vpop.permute.xlu1 %912  ;;  %v897_v50 = vpop.permute.xlu0 %896 }
 0x10e   : > { %v1131_v45 = vsel %vm1119_vm8, %v1114_v18, %v913_v38  ;;  %v1123_v52 = vsel %vm1119_vm8, %v1106_v44, %v897_v50 }
 0x10f   : > { %968 = vrot.lane.b32.xlu1 %v609_v31, %s1793_s4 }
 0x110   : > { %952 = vrot.lane.b32.xlu0 %v589_v51, %s1793_s4 }
 0x111   : > { %v959_v39 = vpop.permute.xlu1 %958  ;;  %v943_v48 = vpop.permute.xlu0 %942 }
 0x112   : > { %v1147_v46 = vsel %vm1136_vm9, %v1130_v58, %v959_v39  ;;  %v1139_v24 = vsel %vm1136_vm9, %v1122_v5, %v943_v48 }
 0x113   : > { %1014 = vrot.lane.b32.xlu1 %v647_v4, %s1794_s9 }
 0x114   : > { %998 = vrot.lane.b32.xlu0 %v627_v43, %s1794_s9 }
 0x115   : > { %v773_v9 = vpop.permute.xlu1 %772  ;;  %v757_v42 = vpop.permute.xlu0 %756 }
 0x116   : > { %v1082_v8 = vsel %vm1068_vm5, %v1065_v41, %v773_v9  ;;  %v1074_v53 = vsel %vm1068_vm5, %v1057_v25, %v757_v42 }
 0x117   : > { %1016 = vrot.lane.b32.xlu1 %v649_v15, %s1794_s9 }
 0x118   : > { %1000 = vrot.lane.b32.xlu0 %v629_v60, %s1794_s9 }
 0x119   : > { %v819_v35 = vpop.permute.xlu1 %818  ;;  %v803_v61 = vpop.permute.xlu0 %802 }
 0x11a   : > { %v2497_v13 = vsel %vm1085_vm6, %v1081_v6, %v819_v35  ;;  %v2500_v26 = vsel %vm1085_vm6, %v1073_v22, %v803_v61 }
 0x11d   : > { %v961_v27 = vpop.permute.xlu1 %960  ;;  %v945_v20 = vpop.permute.xlu0 %944 }
 0x11e   : > { %v1148_v2 = vsel %vm1136_vm9, %v1131_v45, %v961_v27  ;;  %v1140_v41 = vsel %vm1136_vm9, %v1123_v52, %v945_v20 }
 0x121   : > { %v1007_v54 = vpop.permute.xlu1 %1006  ;;  %v991_v55 = vpop.permute.xlu0 %990 }
 0x122   : > { %v1164_v28 = vsel %vm1153_vm10, %v1147_v46, %v1007_v54  ;;  %v1156_v57 = vsel %vm1153_vm10, %v1139_v24, %v991_v55 }
 0x123   : > { %1668 = vmatprep.mubr.msk.f32.mxu0 %vm1173_vm11, %v1156_v57  ;;  %1680 = vmatprep.mubr.msk.f32.mxu1 %vm1173_vm11, %v1164_v28 }
 0x125   : > { %v679_v56 = vpop.permute.xlu1 %678  ;;  %v663_v62 = vpop.permute.xlu0 %662 }
 0x126   : > { %v1049_v37 = vsel %vm1034_vm3, %v2689_v59, %v679_v56  ;;  %v1041_v12 = vsel %vm1034_vm3, %v2690_v11, %v663_v62 }
 0x129   : > { %v821_v7 = vpop.permute.xlu1 %820  ;;  %v805_v47 = vpop.permute.xlu0 %804 }
 0x12a   : > { %v1099_v40 = vsel %vm1085_vm6, %v1082_v8, %v821_v7  ;;  %v1091_v14 = vsel %vm1085_vm6, %v1074_v53, %v805_v47 }
 0x12d   : > { %v867_v29 = vpop.permute.xlu1 %866  ;;  %v851_v16 = vpop.permute.xlu0 %850 }
 0x12e   : > { %v1115_v8 = vsel %vm1102_vm7, %v2497_v13, %v867_v29  ;;  %v1107_v53 = vsel %vm1102_vm7, %v2500_v26, %v851_v16 }
 0x131   : > { %v1009_v25 = vpop.permute.xlu1 %1008  ;;  %v993_v63 = vpop.permute.xlu0 %992 }
 0x132   : > { %v1165_v10 = vsel %vm1153_vm10, %v1148_v2, %v1009_v25  ;;  %v1157_v1 = vsel %vm1153_vm10, %v1140_v41, %v993_v63 }
 0x133   : > { %1669 = vmatmul.mubr.msk.f32.gmra.mrb[2].mxu0 %vm1173_vm11, %v1157_v1  ;;  %1681 = vmatmul.mubr.msk.f32.gmra.mrb[2].mxu1 %vm1173_vm11, %v1165_v10 }
 0x135   : > { %v2534_v21 = vpop.permute.xlu1 %680  ;;  %v2536_v17 = vpop.permute.xlu0 %664 }
 0x139   : > { %v727_v3 = vpop.permute.xlu1 %726  ;;  %v711_v0 = vpop.permute.xlu0 %710 }
 0x13a   : > { %v1066_v6 = vsel %vm1051_vm4, %v1049_v37, %v727_v3  ;;  %v1058_v22 = vsel %vm1051_vm4, %v1041_v12, %v711_v0  ;;  %v2691_v37 = vld [vmem:[#allocation4_spill] sm:$0xff]  ;;  %v2692_v0 = vld [vmem:[#allocation5_spill] sm:$0xff] }
 0x13b   : > { %v1050_v11 = vsel %vm1034_vm3, %v2691_v37, %v2534_v21 }
 0x13d   : > { %v869_v23 = vpop.permute.xlu1 %868  ;;  %v853_v30 = vpop.permute.xlu0 %852 }
 0x13e   : > { %v1116_v54 = vsel %vm1102_vm7, %v1099_v40, %v869_v23  ;;  %v1108_v55 = vsel %vm1102_vm7, %v1091_v14, %v853_v30  ;;  %v1042_v23 = vsel %vm1034_vm3, %v2692_v0, %v2536_v17  ;;  %v1378_v0 = vld [vmem:[%s2607_s24 + $0x38] sm:$0xff] }
 0x141   : > { %v915_v31 = vpop.permute.xlu1 %914  ;;  %v899_v32 = vpop.permute.xlu0 %898 }
 0x142   : > { %v1132_v35 = vsel %vm1119_vm8, %v1115_v8, %v915_v31  ;;  %v1124_v61 = vsel %vm1119_vm8, %v1107_v53, %v899_v32 }
 0x145   : > { %v729_v33 = vpop.permute.xlu1 %728  ;;  %v713_v38 = vpop.permute.xlu0 %712 }
 0x146   : > { %v1059_v31 = vsel %vm1051_vm4, %v1042_v23, %v713_v38  ;;  %v1385_v23 = vld [vmem:[%s2607_s24 + $0x70] sm:$0xff] }
 0x149   : > { %v775_v50 = vpop.permute.xlu1 %774  ;;  %v759_v51 = vpop.permute.xlu0 %758 }
 0x14a   : > { %v1083_v25 = vsel %vm1068_vm5, %v1066_v6, %v775_v50  ;;  %v1075_v10 = vsel %vm1068_vm5, %v1058_v22, %v759_v51  ;;  %v1067_v6 = vsel %vm1051_vm4, %v1050_v11, %v729_v33 }
 0x14d   : > { %v917_v4 = vpop.permute.xlu1 %916  ;;  %v901_v34 = vpop.permute.xlu0 %900 }
 0x14e   : > { %v1133_v28 = vsel %vm1119_vm8, %v1116_v54, %v917_v4  ;;  %v1125_v57 = vsel %vm1119_vm8, %v1108_v55, %v901_v34 }
 0x151   : > { %v963_v39 = vpop.permute.xlu1 %962  ;;  %v947_v48 = vpop.permute.xlu0 %946 }
 0x152   : > { %v1149_v27 = vsel %vm1136_vm9, %v1132_v35, %v963_v39  ;;  %v1141_v36 = vsel %vm1136_vm9, %v1124_v61, %v947_v48 }
 0x155   : > { %v777_v43 = vpop.permute.xlu1 %776 }
 0x156   : > { %v761_v49 = vpop.permute.xlu0 %760  ;;  %v1084_v32 = vsel %vm1068_vm5, %v1067_v6, %v777_v43 }
 0x157   : > { %v1076_v4 = vsel %vm1068_vm5, %v1059_v31, %v761_v49 }
 0x159   : > { %v823_v15 = vpop.permute.xlu1 %822 }
 0x15a   : > { %v807_v9 = vpop.permute.xlu0 %806  ;;  %v1100_v1 = vsel %vm1085_vm6, %v1083_v25, %v823_v15  ;;  %v1375_v25 = vld [vmem:[%s2607_s24 + $0x20] sm:$0xff] }
 0x15b   : > { %v1092_v12 = vsel %vm1085_vm6, %v1075_v10, %v807_v9 }
 0x15d   : > { %v965_v42 = vpop.permute.xlu1 %964 }
 0x15e   : > { %v949_v60 = vpop.permute.xlu0 %948  ;;  %v1150_v56 = vsel %vm1136_vm9, %v1133_v28, %v965_v42  ;;  %v1374_v28 = vld [vmem:[%s2607_s24 + $0x18] sm:$0xff] }
 0x15f   : > { %v1142_v7 = vsel %vm1136_vm9, %v1125_v57, %v949_v60  ;;  %v1382_v57 = vld [vmem:[%s2607_s24 + $0x58] sm:$0xff] }
 0x161   : > { %v1011_v20 = vpop.permute.xlu1 %1010 }
 0x162   : > { %v1166_v19 = vsel %vm1153_vm10, %v1149_v27, %v1011_v20  ;;  %v995_v58 = vpop.permute.xlu0 %994  ;;  %v1380_v27 = vld [vmem:[%s2607_s24 + $0x48] sm:$0xff] }
 0x163   : > { %v1158_v5 = vsel %vm1153_vm10, %v1141_v36, %v995_v58  ;;  %1683 = vmatprep.mubr.msk.f32.mxu1 %vm1173_vm11, %v1166_v19  ;;  %v1372_v20 = vld [vmem:[%s2607_s24 + $0x8] sm:$0xff]  ;;  %v1379_v36 = vld [vmem:[%s2607_s24 + $0x40] sm:$0xff] }
 0x164   : > { %1671 = vmatprep.mubr.msk.f32.mxu0 %vm1173_vm11, %v1158_v5  ;;  %v1371_v58 = vld [vmem:[%s2607_s24] sm:$0xff] }
 0x165   : > { %v825_v13 = vpop.permute.xlu1 %824 }
 0x166   : > { %v809_v26 = vpop.permute.xlu0 %808  ;;  %v1101_v34 = vsel %vm1085_vm6, %v1084_v32, %v825_v13 }
 0x167   : > { %v1093_v48 = vsel %vm1085_vm6, %v1076_v4, %v809_v26 }
 0x169   : > { %v871_v46 = vpop.permute.xlu1 %870 }
 0x16a   : > { %v855_v24 = vpop.permute.xlu0 %854  ;;  %v1117_v3 = vsel %vm1102_vm7, %v1100_v1, %v871_v46 }
 0x16b   : > { %v1109_v30 = vsel %vm1102_vm7, %v1092_v12, %v855_v24 }
 0x16d   : > { %v1013_v62 = vpop.permute.xlu1 %1012 }
 0x16e   : > { %v1167_v47 = vsel %vm1153_vm10, %v1150_v56, %v1013_v62  ;;  %v997_v29 = vpop.permute.xlu0 %996  ;;  %v1373_v56 = vld [vmem:[%s2607_s24 + $0x10] sm:$0xff] }
 0x16f   : > { %v1159_v16 = vsel %vm1153_vm10, %v1142_v7, %v997_v29  ;;  %1684 = vmatmul.mubr.msk.f32.gmra.mrb[4].mxu1 %vm1173_vm11, %v1167_v47  ;;  %v1381_v62 = vld [vmem:[%s2607_s24 + $0x50] sm:$0xff] }
 0x170   : > { %1672 = vmatmul.mubr.msk.f32.gmra.mrb[4].mxu0 %vm1173_vm11, %v1159_v16 }
 0x171   : > { %v873_v40 = vpop.permute.xlu1 %872 }
 0x172   : > { %v857_v14 = vpop.permute.xlu0 %856  ;;  %v1118_v38 = vsel %vm1102_vm7, %v1101_v34, %v873_v40 }
 0x173   : > { %v1110_v15 = vsel %vm1102_vm7, %v1093_v48, %v857_v14 }
 0x175   : > { %v919_v18 = vpop.permute.xlu1 %918 }
 0x176   : > { %v903_v44 = vpop.permute.xlu0 %902  ;;  %v1134_v22 = vsel %vm1119_vm8, %v1117_v3, %v919_v18  ;;  %v1386_v3 = vld [vmem:[%s2607_s24 + $0x78] sm:$0xff] }
 0x177   : > { %v1126_v21 = vsel %vm1119_vm8, %v1109_v30, %v903_v44  ;;  %v1377_v30 = vld [vmem:[%s2607_s24 + $0x30] sm:$0xff] }
 0x179   : > { %v921_v45 = vpop.permute.xlu1 %920 }
 0x17a   : > { %v905_v52 = vpop.permute.xlu0 %904  ;;  %v1135_v49 = vsel %vm1119_vm8, %v1118_v38, %v921_v45  ;;  %v1384_v45 = vld [vmem:[%s2607_s24 + $0x68] sm:$0xff] }
 0x17b   : > { %v1127_v9 = vsel %vm1119_vm8, %v1110_v15, %v905_v52  ;;  %v1376_v52 = vld [vmem:[%s2607_s24 + $0x28] sm:$0xff] }
 0x17d   : > { %v967_v2 = vpop.permute.xlu1 %966 }
 0x17e   : > { %v951_v41 = vpop.permute.xlu0 %950  ;;  %v1151_v50 = vsel %vm1136_vm9, %v1134_v22, %v967_v2  ;;  %v1383_v2 = vld [vmem:[%s2607_s24 + $0x60] sm:$0xff] }
 0x17f   : > { %v1143_v17 = vsel %vm1136_vm9, %v1126_v21, %v951_v41 }
 0x181   : > { %v969_v63 = vpop.permute.xlu1 %968 }
 0x182   : > { %v953_v59 = vpop.permute.xlu0 %952  ;;  %v1152_v42 = vsel %vm1136_vm9, %v1135_v49, %v969_v63 }
 0x183   : > { %v1144_v8 = vsel %vm1136_vm9, %v1127_v9, %v953_v59 }
 0x185   : > { %v1015_v51 = vpop.permute.xlu1 %1014 }
 0x186   : > { %v1168_v33 = vsel %vm1153_vm10, %v1151_v50, %v1015_v51  ;;  %v999_v39 = vpop.permute.xlu0 %998 }
 0x187   : > { %v1160_v43 = vsel %vm1153_vm10, %v1143_v17, %v999_v39  ;;  %1686 = vmatprep.mubr.msk.f32.mxu1 %vm1173_vm11, %v1168_v33 }
 0x188   : > { %1674 = vmatprep.mubr.msk.f32.mxu0 %vm1173_vm11, %v1160_v43 }
 0x189   : > { %v1017_v60 = vpop.permute.xlu1 %1016 }
 0x18a   : > { %v1169_v53 = vsel %vm1153_vm10, %v1152_v42, %v1017_v60  ;;  %v1001_v35 = vpop.permute.xlu0 %1000 }
 0x18b   : > { %v1161_v61 = vsel %vm1153_vm10, %v1144_v8, %v1001_v35  ;;  %1687 = vmatmul.mubr.msk.f32.gmra.mrb[6].mxu1 %vm1173_vm11, %v1169_v53 }
 0x18c   : > { %1675 = vmatmul.mubr.msk.f32.gmra.mrb[6].mxu0 %vm1173_vm11, %v1161_v61 }
 0x1c6   : > { %v1679_v19 = vpop.f32.mrb[0].mxu1 }
 0x1c7   : > { %v1667_v5 = vpop.f32.mrb[0].mxu0  ;;  %v1396_v13 = vadd.f32 %v1679_v19, %v1380_v27  ;;  %v1332_v26 = vpop.f32.mrb[1].mxu1 }
 0x1c8   : > { %v1388_v46 = vadd.f32 %v1667_v5, %v1372_v20  ;;  %v1292_v24 = vpop.f32.mrb[1].mxu0  ;;  %v1395_v54 = vadd.f32 %v1379_v36, %v1332_v26 }
 0x1c9   : > { %1412 = vst.msk [vmem:[%s2615_s13 + $0x48] sm:$0xff] %vm1051_vm4, %v1396_v13  ;;  %v1387_v55 = vadd.f32 %v1371_v58, %v1292_v24 }
 0x1ca   : > { %1404 = vst.msk [vmem:[%s2615_s13 + $0x8] sm:$0xff] %vm1051_vm4, %v1388_v46  ;;  %1411 = vst.msk [vmem:[%s2615_s13 + $0x40] sm:$0xff] %vm1051_vm4, %v1395_v54 }
 0x1cb   : > { %1403 = vst.msk [vmem:[%s2615_s13] sm:$0xff] %vm1051_vm4, %v1387_v55 }
 0x206   : > { %v1670_v7 = vpop.f32.mrb[2].mxu0  ;;  %v1682_v47 = vpop.f32.mrb[2].mxu1 }
 0x207   : > { %v1390_v29 = vadd.f32 %v1670_v7, %v1374_v28  ;;  %v1398_v16 = vadd.f32 %v1682_v47, %v1382_v57  ;;  %v1302_v40 = vpop.f32.mrb[3].mxu0  ;;  %v1342_v14 = vpop.f32.mrb[3].mxu1 }
 0x208   : > { %v1389_v18 = vadd.f32 %v1373_v56, %v1302_v40  ;;  %v1397_v44 = vadd.f32 %v1381_v62, %v1342_v14 }
 0x209   : > { %1406 = vst.msk [vmem:[%s2615_s13 + $0x18] sm:$0xff] %vm1051_vm4, %v1390_v29  ;;  %1414 = vst.msk [vmem:[%s2615_s13 + $0x58] sm:$0xff] %vm1051_vm4, %v1398_v16 }
 0x20a   : > { %1405 = vst.msk [vmem:[%s2615_s13 + $0x10] sm:$0xff] %vm1051_vm4, %v1389_v18  ;;  %1413 = vst.msk [vmem:[%s2615_s13 + $0x50] sm:$0xff] %vm1051_vm4, %v1397_v44 }
 0x242   : > { %v1685_v41 = vpop.f32.mrb[4].mxu1 }
 0x243   : > { %v1673_v63 = vpop.f32.mrb[4].mxu0  ;;  %v1400_v10 = vadd.f32 %v1685_v41, %v1384_v45  ;;  %v1352_v1 = vpop.f32.mrb[5].mxu1 }
 0x244   : > { %v1392_v59 = vadd.f32 %v1673_v63, %v1376_v52  ;;  %v1312_v37 = vpop.f32.mrb[5].mxu0  ;;  %v1399_v11 = vadd.f32 %v1383_v2, %v1352_v1 }
 0x245   : > { %1416 = vst.msk [vmem:[%s2615_s13 + $0x68] sm:$0xff] %vm1051_vm4, %v1400_v10  ;;  %v1391_v12 = vadd.f32 %v1375_v25, %v1312_v37 }
 0x246   : > { %1408 = vst.msk [vmem:[%s2615_s13 + $0x28] sm:$0xff] %vm1051_vm4, %v1392_v59  ;;  %1415 = vst.msk [vmem:[%s2615_s13 + $0x60] sm:$0xff] %vm1051_vm4, %v1399_v11 }
 0x247   : > { %1407 = vst.msk [vmem:[%s2615_s13 + $0x20] sm:$0xff] %vm1051_vm4, %v1391_v12 }
 0x25e   : > { %v1688_v6 = vpop.f32.mrb[6].mxu1 }
 0x25f   : > { %v1676_v22 = vpop.f32.mrb[6].mxu0  ;;  %v1402_v31 = vadd.f32 %v1688_v6, %v1386_v3  ;;  %v1362_v32 = vpop.f32.mrb[7].mxu1 }
 0x260   : > { %v1394_v21 = vadd.f32 %v1676_v22, %v1378_v0  ;;  %v1322_v50 = vpop.f32.mrb[7].mxu0  ;;  %v1401_v51 = vadd.f32 %v1385_v23, %v1362_v32 }
 0x261   : > { %1418 = vst.msk [vmem:[%s2615_s13 + $0x78] sm:$0xff] %vm1051_vm4, %v1402_v31  ;;  %v1393_v4 = vadd.f32 %v1377_v30, %v1322_v50 }
 0x262   : > { %1410 = vst.msk [vmem:[%s2615_s13 + $0x38] sm:$0xff] %vm1051_vm4, %v1394_v21  ;;  %1417 = vst.msk [vmem:[%s2615_s13 + $0x70] sm:$0xff] %vm1051_vm4, %v1401_v51 }
 0x263   : > { %1409 = vst.msk [vmem:[%s2615_s13 + $0x30] sm:$0xff] %vm1051_vm4, %v1393_v4 }
 0x264 PF: > { %s13_s16 = sadd.s32 1, %s1785_s16   ;;  %s2693_s12 = smov %s1777_s14 }
 0x265   : > { %p10_p7 = scmp.ge.s32.totalorder %s13_s16, 6   ;;  %s2694_s13 = smov %s1781_s15 }
 0x266   : > { %s2695_s14 = smov %s2698_s17  ;;  %s2696_s15 = smov %s2702_s18 }
 0x267   :  { %12 = sbr.rel (!%p10_p7) target bundleno = 3 (0x3), region = 71 }

</bundles_post_ra>
